<compile_context>
chip_gen: v7x
topology: tpu7x:2x2x1
jax: 0.10.0
libtpu: 0.0.40
codegen_flags: <defaults>
</compile_context>

<pallas_src>
import functools

import jax
import jax.numpy as jnp
import numpy as np
from jax.experimental import pallas as pl
from jax.experimental.pallas import tpu as pltpu


# ----------------------------------------------------------------------------
# Fused kernel: one (batch*group, n-tile) slice per grid step.
# Tiles are (C, k, tn): k on sublanes, n on lanes (lane-dense).
# ----------------------------------------------------------------------------
def _gt_fused_kernel(w_lpe_ref, b_lpe_ref, w_gpe_ref, b_gpe_ref,      # SMEM
                     lq_ref, lk_ref, lvv_ref, lxyz_ref,
                     gq_ref, gk_ref, gvv_ref, gnx_ref, xyz_ref,       # VMEM in
                     lv_ref, gv_ref, la_ref):                         # VMEM out
    f32 = jnp.float32
    lq = lq_ref[0].astype(f32)       # (lcq_g, tn)
    lk = lk_ref[0].astype(f32)       # (lcq_g, k, tn)
    lvv = lvv_ref[0].astype(f32)     # (lcv_g, k, tn)
    lxyz = lxyz_ref[0].astype(f32)   # (cv_g,  k, tn)
    gq = gq_ref[0].astype(f32)       # (gcq_g, tn)
    gk = gk_ref[0].astype(f32)       # (gcq_g, k, tn)
    gvv = gvv_ref[0].astype(f32)     # (gcv_g, k, tn)
    gnx = gnx_ref[0].astype(f32)     # (3, k, tn)  gathered neighbour xyz
    xyz = xyz_ref[0].astype(f32)     # (3, tn)

    lcq_g = lq.shape[0]
    gcq_g = gq.shape[0]
    lcv_g = lvv.shape[0]
    gcv_g = gvv.shape[0]
    cv_g = lxyz.shape[0]

    # ---- local attention: logits (k, tn), softmax over k (sublane axis) ----
    la = lq[0:1, :] * lk[0]
    for c in range(1, lcq_g):
        la = la + lq[c:c + 1, :] * lk[c]
    la = jnp.exp(la - jnp.max(la, axis=0, keepdims=True))
    la = la * pl.reciprocal(jnp.sum(la, axis=0, keepdims=True), approx=True)
    la_ref[0] = la                                       # exported for centrality

    # ---- global attention ----
    ga = gq[0:1, :] * gk[0]
    for c in range(1, gcq_g):
        ga = ga + gq[c:c + 1, :] * gk[c]
    ga = jnp.exp(ga - jnp.max(ga, axis=0, keepdims=True))
    ga = ga * pl.reciprocal(jnp.sum(ga, axis=0, keepdims=True), approx=True)

    # ---- local branch: gathered-value half, then fused lpe(conv+BN+ReLU) ----
    lv_ref[0, 0:lcv_g, :] = jnp.sum(la[None] * lvv, axis=1)          # (lcv_g, tn)
    lpe_rows = []
    for o in range(lcv_g):
        acc = w_lpe_ref[o, 0] * lxyz[0]
        for c in range(1, cv_g):
            acc = acc + w_lpe_ref[o, c] * lxyz[c]
        pe = jnp.maximum(acc + b_lpe_ref[o], 0.0)                    # (k, tn)
        lpe_rows.append(jnp.sum(la * pe, axis=0, keepdims=True))     # (1, tn)
    lv_ref[0, lcv_g:2 * lcv_g, :] = jnp.concatenate(lpe_rows, axis=0)

    # ---- global branch: gathered-value half, then fused gpe over the
    #      relative-position features built in-register (no (b,10,M) in HBM) --
    gv_ref[0, 0:gcv_g, :] = jnp.sum(ga[None] * gvv, axis=1)
    xr = [xyz[c:c + 1, :] for c in range(3)]                          # (1, tn)
    rel = [xr[c] - gnx[c] for c in range(3)]                          # (k, tn)
    dis = jnp.sqrt(rel[0] * rel[0] + rel[1] * rel[1] + rel[2] * rel[2])
    feats = [dis, rel[0], rel[1], rel[2], xr[0], xr[1], xr[2],
             gnx[0], gnx[1], gnx[2]]                                  # 10 channels
    gpe_rows = []
    for o in range(gcv_g):
        acc = w_gpe_ref[o, 0] * feats[0]
        for c in range(1, 10):
            acc = acc + w_gpe_ref[o, c] * feats[c]
        pe = jnp.maximum(acc + b_gpe_ref[o], 0.0)
        gpe_rows.append(jnp.sum(ga * pe, axis=0, keepdims=True))
    gv_ref[0, gcv_g:2 * gcv_g, :] = jnp.concatenate(gpe_rows, axis=0)


def _pick_tile_n(n):
    """Largest n-tile <= 512 that is a multiple of 128 or the full axis."""
    if n <= 512:
        return n
    for t in (512, 384, 256, 128):
        if n % t == 0:
            return t
    return n


def gt_fused_attention(w_lpe, b_lpe, w_gpe, b_gpe, *,
                       lq, lk, lvv, lxyz, gq, gk, gvv, gnx, xyz):
    B, lcq_g, k, n = lk.shape
    lcv_g = lvv.shape[1]
    gcq_g = gq.shape[1]
    gcv_g = gvv.shape[1]
    cv_g = lxyz.shape[1]
    tn = _pick_tile_n(n)
    grid = (B, n // tn)

    def vspec4(c):
        return pl.BlockSpec((1, c, k, tn), lambda i, j: (i, 0, 0, j))

    def vspec3(c):
        return pl.BlockSpec((1, c, tn), lambda i, j: (i, 0, j))

    smem = pl.BlockSpec(memory_space=pltpu.MemorySpace.SMEM)

    out_shape = (
        jax.ShapeDtypeStruct((B, 2 * lcv_g, n), jnp.float32),
        jax.ShapeDtypeStruct((B, 2 * gcv_g, n), jnp.float32),
        jax.ShapeDtypeStruct((B, k, n), jnp.float32),
    )
    out_specs = (vspec3(2 * lcv_g), vspec3(2 * gcv_g), vspec3(k))

    return pl.pallas_call(
        _gt_fused_kernel,
        out_shape=out_shape,
        grid=grid,
        in_specs=[smem, smem, smem, smem,
                  vspec3(lcq_g), vspec4(lcq_g), vspec4(lcv_g), vspec4(cv_g),
                  vspec3(gcq_g), vspec4(gcq_g), vspec4(gcv_g), vspec4(3),
                  vspec3(3)],
        out_specs=out_specs,
        compiler_params=pltpu.CompilerParams(
            dimension_semantics=("parallel", "parallel"),
            vmem_limit_bytes=32 * 1024 * 1024),
    )(w_lpe, b_lpe, w_gpe, b_gpe,
      lq, lk, lvv, lxyz, gq, gk, gvv, gnx, xyz)


# Pure-JAX reference of the fused kernel (same inputs, f32 math, exact softmax).
def gt_fused_attention_ref(w_lpe, b_lpe, w_gpe, b_gpe, *,
                           lq, lk, lvv, lxyz, gq, gk, gvv, gnx, xyz):
    f32 = jnp.float32
    lq, lk, lvv, lxyz, gq, gk, gvv, gnx, xyz = [
        a.astype(f32) for a in (lq, lk, lvv, lxyz, gq, gk, gvv, gnx, xyz)]
    la = jax.nn.softmax(jnp.einsum("bcn,bckn->bkn", lq, lk), axis=1)
    ga = jax.nn.softmax(jnp.einsum("bcn,bckn->bkn", gq, gk), axis=1)
    lpe = jax.nn.relu(jnp.einsum("oc,bckn->bokn", w_lpe, lxyz)
                      + b_lpe[None, :, None, None])
    rel = xyz[:, :, None, :] - gnx
    dis = jnp.sqrt(jnp.sum(rel * rel, axis=1, keepdims=True))
    xyz_t = jnp.broadcast_to(xyz[:, :, None, :], gnx.shape)
    gfeat = jnp.concatenate([dis, rel, xyz_t, gnx], axis=1)           # (B,10,k,n)
    gpe = jax.nn.relu(jnp.einsum("oc,bckn->bokn", w_gpe, gfeat)
                      + b_gpe[None, :, None, None])
    lv = jnp.concatenate([jnp.einsum("bkn,bckn->bcn", la, lvv),
                          jnp.einsum("bkn,bckn->bcn", la, lpe)], axis=1)
    gv = jnp.concatenate([jnp.einsum("bkn,bckn->bcn", ga, gvv),
                          jnp.einsum("bkn,bckn->bcn", ga, gpe)], axis=1)
    return lv, gv, la


# ----------------------------------------------------------------------------
# Parameters (deterministic synthetic init; BN in eval mode, folded to s/b)
# ----------------------------------------------------------------------------
def init_gt_params(key, d_out, groups):
    gcv = d_out // 4
    lcv = d_out // 2 - gcv
    lcv_g = lcv // groups
    gcv_g = gcv // groups
    cv_g = (d_out // 2) // groups          # lpe in-channels = d_out // (2*groups)
    ks = jax.random.split(key, 4)
    eps = 1e-5

    def bn_fold(kk, c):
        k1, k2, k3, k4 = jax.random.split(kk, 4)
        gamma = 1.0 + 0.1 * jax.random.normal(k1, (c, 1), jnp.float32)
        beta = 0.1 * jax.random.normal(k2, (c, 1), jnp.float32)
        mean = 0.1 * jax.random.normal(k3, (c, 1), jnp.float32)
        var = 1.0 + 0.1 * jax.random.uniform(k4, (c, 1), jnp.float32)
        scale = gamma / jnp.sqrt(var + eps)
        bias = beta - mean * scale
        return scale, bias

    w_lpe = 0.2 * jax.random.normal(ks[0], (lcv_g, cv_g), jnp.float32)
    s_lpe, b_lpe = bn_fold(ks[1], lcv_g)
    w_gpe = 0.2 * jax.random.normal(ks[2], (gcv_g, 10), jnp.float32)
    s_gpe, b_gpe = bn_fold(ks[3], gcv_g)
    return dict(w_lpe=w_lpe, s_lpe=s_lpe, b_lpe=b_lpe,
                w_gpe=w_gpe, s_gpe=s_gpe, b_gpe=b_gpe)


# ----------------------------------------------------------------------------
# Full GTModule.forward
# ----------------------------------------------------------------------------
def gt_module_forward(params, xyz, l_xyz, query, value, neigh_idx, idx_base,
                      attention_centrality, *, d_out, groups,
                      use_pallas=True, storage_dtype=jnp.bfloat16):
    # idx_base is unused: the per-batch JAX gather already reproduces the
    # flattened `pc.view(b*n, d)[idx + idx_base]` gather of the PyTorch code.
    del idx_base
    b, cv, n, _ = value.shape
    cq = query.shape[1]
    k = neigh_idx.shape[-1]
    g = groups
    gcv = d_out // 4
    lcv = d_out // 2 - gcv
    gcq = cq // 2
    lcq = cq - gcq
    lcq_g, lcv_g, gcq_g, gcv_g = lcq // g, lcv // g, gcq // g, gcv // g
    cv_g = cv // g
    B = b * g

    neigh = jnp.broadcast_to(neigh_idx[:, None], (b, g, n, k)).astype(jnp.int32)
    _, ac_idx = jax.lax.top_k(attention_centrality, k)                # (b, g, k)
    ac_idx = jnp.broadcast_to(ac_idx[:, :, None, :], (b, g, n, k)).astype(jnp.int32)

    q = query[..., 0]                                                 # (b, cq, n)
    v = value[..., 0]                                                 # (b, cv, n)
    lq = q[:, :lcq].reshape(b, g, lcq_g, n)
    lv_feat = v[:, :lcv].reshape(b, g, lcv_g, n)
    gq = q[:, lcq:].reshape(b, g, gcq_g, n)
    gv_feat = v[:, lcv:].reshape(b, g, gcv_g, n)

    xyz_cn = jnp.transpose(xyz, (0, 2, 1))                            # (b, 3, n)
    xyz_g = jnp.broadcast_to(xyz_cn[:, None], (b, g, 3, n))           # (b, g, 3, n)

    # per-point tables (key | value | xyz) gathered at the neighbours
    ltab = jnp.transpose(jnp.concatenate([lq, lv_feat, xyz_g], axis=2), (0, 1, 3, 2))
    gtab = jnp.transpose(jnp.concatenate([gq, gv_feat, xyz_g], axis=2), (0, 1, 3, 2))

    def batch_gather(pc, idx):
        # pc: (b, g, n, d); idx: (b, g, n, k) -> (b, g, d, k, n)
        d = pc.shape[-1]
        flat = idx.reshape(b, g, n * k)
        gath = jnp.take_along_axis(pc, flat[..., None], axis=2)       # (b,g,n*k,d)
        gath = gath.reshape(b, g, n, k, d)
        return jnp.transpose(gath, (0, 1, 4, 3, 2))

    lfeat = batch_gather(ltab, neigh)
    lk = lfeat[:, :, :lcq_g]
    lvv = lfeat[:, :, lcq_g:lcq_g + lcv_g]
    gfeat = batch_gather(gtab, ac_idx)
    gk = gfeat[:, :, :gcq_g]
    gvv = gfeat[:, :, gcq_g:gcq_g + gcv_g]
    gnx = gfeat[:, :, -3:]                                            # (b,g,3,k,n)

    # lpe input directly in (b, g, cv_g, k, n) layout (no flat-M conv anymore)
    lxyz = jnp.swapaxes(l_xyz, -1, -2)

    sd = storage_dtype
    tiles = dict(
        lq=lq.reshape(B, lcq_g, n).astype(sd),
        lk=lk.reshape(B, lcq_g, k, n).astype(sd),
        lvv=lvv.reshape(B, lcv_g, k, n).astype(sd),
        lxyz=lxyz.reshape(B, cv_g, k, n).astype(sd),
        gq=gq.reshape(B, gcq_g, n).astype(sd),
        gk=gk.reshape(B, gcq_g, k, n).astype(sd),
        gvv=gvv.reshape(B, gcv_g, k, n).astype(sd),
        gnx=gnx.reshape(B, 3, k, n).astype(sd),
        xyz=xyz_g.reshape(B, 3, n).astype(sd),
    )

    # fold the BN scale into the conv weights (wrapper-side, tiny)
    w_lpe = (params["w_lpe"] * params["s_lpe"]).astype(jnp.float32)
    b_lpe = params["b_lpe"][:, 0].astype(jnp.float32)
    w_gpe = (params["w_gpe"] * params["s_gpe"]).astype(jnp.float32)
    b_gpe = params["b_gpe"][:, 0].astype(jnp.float32)

    fn = gt_fused_attention if use_pallas else gt_fused_attention_ref
    lv_out, gv_out, la = fn(w_lpe, b_lpe, w_gpe, b_gpe, **tiles)

    v_out = jnp.concatenate([lv_out.reshape(b, g, 2 * lcv_g, n),
                             gv_out.reshape(b, g, 2 * gcv_g, n)], axis=2)
    v_out = v_out.reshape(b, -1, n, 1)                                # (b,d_out,n,1)

    # attention centrality: O(n*k) XLA scatter-add of the softmaxed local attn
    la_bnk = jnp.swapaxes(la, 1, 2).astype(jnp.float32)               # (B, n, k)
    nidx = neigh.reshape(B, n, k)

    def scat(a, idx):
        return jnp.zeros((n,), jnp.float32).at[idx.reshape(-1)].add(a.reshape(-1))

    centrality = jax.vmap(scat)(la_bnk, nidx).reshape(b, g, n)
    return v_out, centrality


# ----------------------------------------------------------------------------
if __name__ == "__main__":
    key = jax.random.PRNGKey(0)
    b, n, k = 2, 16, 8
    d_out, groups = 32, 2
    cq = 16
    cv = d_out // 2                       # value channels expected by the module
    cv_g = cv // groups

    ks = jax.random.split(key, 8)
    xyz = jax.random.normal(ks[0], (b, n, 3), jnp.float32)
    l_xyz = jax.random.normal(ks[1], (b, groups, cv_g, n, k), jnp.float32)
    query = jax.random.normal(ks[2], (b, cq, n, 1), jnp.float32)
    value = jax.random.normal(ks[3], (b, cv, n, 1), jnp.float32)
    neigh_idx = jax.random.randint(ks[4], (b, n, k), 0, n, jnp.int32)
    idx_base = (jnp.arange(b, dtype=jnp.int32) * n).reshape(b, 1, 1)
    attention_centrality = jax.random.uniform(ks[5], (b, groups, n), jnp.float32)

    params = init_gt_params(ks[6], d_out, groups)

    fwd = functools.partial(gt_module_forward, d_out=d_out, groups=groups)
    run_pallas = jax.jit(functools.partial(fwd, use_pallas=True))
    v_out, cent = run_pallas(params, xyz, l_xyz, query, value, neigh_idx,
                             idx_base, attention_centrality)
    jax.block_until_ready((v_out, cent))

    # pure-JAX reference of the fused hot path (same glue, same bf16 inputs,
    # exact softmax).  Tolerance covers the EUP approximate reciprocal.
    v_ref, cent_ref = fwd(params, xyz, l_xyz, query, value, neigh_idx,
                          idx_base, attention_centrality, use_pallas=False)

    assert v_out.shape == (b, d_out, n, 1)
    assert cent.shape == (b, groups, n)
    np.testing.assert_allclose(np.asarray(v_out), np.asarray(v_ref),
                               rtol=1e-2, atol=1e-2)
    np.testing.assert_allclose(np.asarray(cent), np.asarray(cent_ref),
                               rtol=1e-2, atol=1e-2)
    print("KERNEL_OK")
</pallas_src>

<mosaic_0001>
module attributes {stable_mosaic.version = 11 : i64} {
  func.func private @main(%arg0: i32) attributes {dimension_semantics = [#tpu.dimension_semantics<core_parallel>], iteration_bounds = array<i64: 2>, tpu.core_type = #tpu.core_type<sc_scalar_subcore>, window_params = []} {
    return
  }
}

module attributes {stable_mosaic.version = 11 : i64} {
  func.func private @main(%arg0: i32) attributes {dimension_semantics = [#tpu.dimension_semantics<core_parallel>], iteration_bounds = array<i64: 2>, tpu.core_type = #tpu.core_type<sc_scalar_subcore>, window_params = []} {
    return
  }
}

module attributes {stable_mosaic.version = 11 : i64} {
  func.func @_gt_fused_kernel(%arg0: i32, %arg1: i32, %arg2: memref<4x8xf32, #tpu.memory_space<smem>>, %arg3: memref<4xf32, #tpu.memory_space<smem>>, %arg4: memref<4x10xf32, #tpu.memory_space<smem>>, %arg5: memref<4xf32, #tpu.memory_space<smem>>, %arg6: memref<1x4x16xbf16, #tpu.memory_space<vmem>>, %arg7: memref<1x4x8x16xbf16, #tpu.memory_space<vmem>>, %arg8: memref<1x4x8x16xbf16, #tpu.memory_space<vmem>>, %arg9: memref<1x8x8x16xbf16, #tpu.memory_space<vmem>>, %arg10: memref<1x4x16xbf16, #tpu.memory_space<vmem>>, %arg11: memref<1x4x8x16xbf16, #tpu.memory_space<vmem>>, %arg12: memref<1x4x8x16xbf16, #tpu.memory_space<vmem>>, %arg13: memref<1x3x8x16xbf16, #tpu.memory_space<vmem>>, %arg14: memref<1x3x16xbf16, #tpu.memory_space<vmem>>, %arg15: memref<1x8x16xf32, #tpu.memory_space<vmem>>, %arg16: memref<1x8x16xf32, #tpu.memory_space<vmem>>, %arg17: memref<1x8x16xf32, #tpu.memory_space<vmem>>) attributes {dimension_semantics = [#tpu.dimension_semantics<parallel>, #tpu.dimension_semantics<parallel>], iteration_bounds = array<i64: 4, 1>, scalar_prefetch = 0 : i64, scratch_operands = 0 : i64, tpu.core_type = #tpu.core_type<tc>, window_params = [{transform_indices = @transform_0, window_bounds = array<i64: 4, 8>}, {transform_indices = @transform_1, window_bounds = array<i64: 4>}, {transform_indices = @transform_2, window_bounds = array<i64: 4, 10>}, {transform_indices = @transform_3, window_bounds = array<i64: 4>}, {transform_indices = @transform_4, window_bounds = array<i64: 1, 4, 16>}, {transform_indices = @transform_5, window_bounds = array<i64: 1, 4, 8, 16>}, {transform_indices = @transform_6, window_bounds = array<i64: 1, 4, 8, 16>}, {transform_indices = @transform_7, window_bounds = array<i64: 1, 8, 8, 16>}, {transform_indices = @transform_8, window_bounds = array<i64: 1, 4, 16>}, {transform_indices = @transform_9, window_bounds = array<i64: 1, 4, 8, 16>}, {transform_indices = @transform_10, window_bounds = array<i64: 1, 4, 8, 16>}, {transform_indices = @transform_11, window_bounds = array<i64: 1, 3, 8, 16>}, {transform_indices = @transform_12, window_bounds = array<i64: 1, 3, 16>}, {transform_indices = @transform_13, window_bounds = array<i64: 1, 8, 16>}, {transform_indices = @transform_14, window_bounds = array<i64: 1, 8, 16>}, {transform_indices = @transform_15, window_bounds = array<i64: 1, 8, 16>}]} {
    %c0 = arith.constant 0 : index
    %c0_0 = arith.constant 0 : index
    %c0_1 = arith.constant 0 : index
    %0 = vector.load %arg6[%c0, %c0_0, %c0_1] : memref<1x4x16xbf16, #tpu.memory_space<vmem>>, vector<1x4x16xbf16>
    %1 = vector.shape_cast %0 : vector<1x4x16xbf16> to vector<4x16xbf16>
    %2 = arith.extf %1 : vector<4x16xbf16> to vector<4x16xf32>
    %c0_2 = arith.constant 0 : index
    %c0_3 = arith.constant 0 : index
    %c0_4 = arith.constant 0 : index
    %c0_5 = arith.constant 0 : index
    %3 = vector.load %arg7[%c0_2, %c0_3, %c0_4, %c0_5] : memref<1x4x8x16xbf16, #tpu.memory_space<vmem>>, vector<1x4x8x16xbf16>
    %4 = vector.shape_cast %3 : vector<1x4x8x16xbf16> to vector<4x8x16xbf16>
    %5 = arith.extf %4 : vector<4x8x16xbf16> to vector<4x8x16xf32>
    %c0_6 = arith.constant 0 : index
    %c0_7 = arith.constant 0 : index
    %c0_8 = arith.constant 0 : index
    %c0_9 = arith.constant 0 : index
    %6 = vector.load %arg8[%c0_6, %c0_7, %c0_8, %c0_9] : memref<1x4x8x16xbf16, #tpu.memory_space<vmem>>, vector<1x4x8x16xbf16>
    %7 = vector.shape_cast %6 : vector<1x4x8x16xbf16> to vector<4x8x16xbf16>
    %8 = arith.extf %7 : vector<4x8x16xbf16> to vector<4x8x16xf32>
    %c0_10 = arith.constant 0 : index
    %c0_11 = arith.constant 0 : index
    %c0_12 = arith.constant 0 : index
    %c0_13 = arith.constant 0 : index
    %9 = vector.load %arg9[%c0_10, %c0_11, %c0_12, %c0_13] : memref<1x8x8x16xbf16, #tpu.memory_space<vmem>>, vector<1x8x8x16xbf16>
    %10 = vector.shape_cast %9 : vector<1x8x8x16xbf16> to vector<8x8x16xbf16>
    %11 = arith.extf %10 : vector<8x8x16xbf16> to vector<8x8x16xf32>
    %c0_14 = arith.constant 0 : index
    %c0_15 = arith.constant 0 : index
    %c0_16 = arith.constant 0 : index
    %12 = vector.load %arg10[%c0_14, %c0_15, %c0_16] : memref<1x4x16xbf16, #tpu.memory_space<vmem>>, vector<1x4x16xbf16>
    %13 = vector.shape_cast %12 : vector<1x4x16xbf16> to vector<4x16xbf16>
    %14 = arith.extf %13 : vector<4x16xbf16> to vector<4x16xf32>
    %c0_17 = arith.constant 0 : index
    %c0_18 = arith.constant 0 : index
    %c0_19 = arith.constant 0 : index
    %c0_20 = arith.constant 0 : index
    %15 = vector.load %arg11[%c0_17, %c0_18, %c0_19, %c0_20] : memref<1x4x8x16xbf16, #tpu.memory_space<vmem>>, vector<1x4x8x16xbf16>
    %16 = vector.shape_cast %15 : vector<1x4x8x16xbf16> to vector<4x8x16xbf16>
    %17 = arith.extf %16 : vector<4x8x16xbf16> to vector<4x8x16xf32>
    %c0_21 = arith.constant 0 : index
    %c0_22 = arith.constant 0 : index
    %c0_23 = arith.constant 0 : index
    %c0_24 = arith.constant 0 : index
    %18 = vector.load %arg12[%c0_21, %c0_22, %c0_23, %c0_24] : memref<1x4x8x16xbf16, #tpu.memory_space<vmem>>, vector<1x4x8x16xbf16>
    %19 = vector.shape_cast %18 : vector<1x4x8x16xbf16> to vector<4x8x16xbf16>
    %20 = arith.extf %19 : vector<4x8x16xbf16> to vector<4x8x16xf32>
    %c0_25 = arith.constant 0 : index
    %c0_26 = arith.constant 0 : index
    %c0_27 = arith.constant 0 : index
    %c0_28 = arith.constant 0 : index
    %21 = vector.load %arg13[%c0_25, %c0_26, %c0_27, %c0_28] : memref<1x3x8x16xbf16, #tpu.memory_space<vmem>>, vector<1x3x8x16xbf16>
    %22 = vector.shape_cast %21 : vector<1x3x8x16xbf16> to vector<3x8x16xbf16>
    %23 = arith.extf %22 : vector<3x8x16xbf16> to vector<3x8x16xf32>
    %c0_29 = arith.constant 0 : index
    %c0_30 = arith.constant 0 : index
    %c0_31 = arith.constant 0 : index
    %24 = vector.load %arg14[%c0_29, %c0_30, %c0_31] : memref<1x3x16xbf16, #tpu.memory_space<vmem>>, vector<1x3x16xbf16>
    %25 = vector.shape_cast %24 : vector<1x3x16xbf16> to vector<3x16xbf16>
    %26 = arith.extf %25 : vector<3x16xbf16> to vector<3x16xf32>
    %27 = vector.extract_strided_slice %2 {offsets = [0, 0], sizes = [1, 16], strides = [1, 1]} : vector<4x16xf32> to vector<1x16xf32>
    %28 = vector.extract_strided_slice %5 {offsets = [0, 0, 0], sizes = [1, 8, 16], strides = [1, 1, 1]} : vector<4x8x16xf32> to vector<1x8x16xf32>
    %29 = vector.shape_cast %28 : vector<1x8x16xf32> to vector<8x16xf32>
    %30 = vector.broadcast %27 : vector<1x16xf32> to vector<8x16xf32>
    %31 = arith.mulf %30, %29 : vector<8x16xf32>
    %32 = vector.extract_strided_slice %2 {offsets = [1, 0], sizes = [1, 16], strides = [1, 1]} : vector<4x16xf32> to vector<1x16xf32>
    %33 = vector.extract_strided_slice %5 {offsets = [1, 0, 0], sizes = [1, 8, 16], strides = [1, 1, 1]} : vector<4x8x16xf32> to vector<1x8x16xf32>
    %34 = vector.shape_cast %33 : vector<1x8x16xf32> to vector<8x16xf32>
    %35 = vector.broadcast %32 : vector<1x16xf32> to vector<8x16xf32>
    %36 = arith.mulf %35, %34 : vector<8x16xf32>
    %37 = arith.addf %31, %36 : vector<8x16xf32>
    %38 = vector.extract_strided_slice %2 {offsets = [2, 0], sizes = [1, 16], strides = [1, 1]} : vector<4x16xf32> to vector<1x16xf32>
    %39 = vector.extract_strided_slice %5 {offsets = [2, 0, 0], sizes = [1, 8, 16], strides = [1, 1, 1]} : vector<4x8x16xf32> to vector<1x8x16xf32>
    %40 = vector.shape_cast %39 : vector<1x8x16xf32> to vector<8x16xf32>
    %41 = vector.broadcast %38 : vector<1x16xf32> to vector<8x16xf32>
    %42 = arith.mulf %41, %40 : vector<8x16xf32>
    %43 = arith.addf %37, %42 : vector<8x16xf32>
    %44 = vector.extract_strided_slice %2 {offsets = [3, 0], sizes = [1, 16], strides = [1, 1]} : vector<4x16xf32> to vector<1x16xf32>
    %45 = vector.extract_strided_slice %5 {offsets = [3, 0, 0], sizes = [1, 8, 16], strides = [1, 1, 1]} : vector<4x8x16xf32> to vector<1x8x16xf32>
    %46 = vector.shape_cast %45 : vector<1x8x16xf32> to vector<8x16xf32>
    %47 = vector.broadcast %44 : vector<1x16xf32> to vector<8x16xf32>
    %48 = arith.mulf %47, %46 : vector<8x16xf32>
    %49 = arith.addf %43, %48 : vector<8x16xf32>
    %cst = arith.constant dense<0xFF800000> : vector<16xf32>
    %50 = vector.multi_reduction <maximumf>, %49, %cst [0] : vector<8x16xf32> to vector<16xf32>
    %51 = vector.shape_cast %50 : vector<16xf32> to vector<1x16xf32>
    %52 = vector.broadcast %51 : vector<1x16xf32> to vector<8x16xf32>
    %53 = arith.subf %49, %52 : vector<8x16xf32>
    %54 = math.exp %53 : vector<8x16xf32>
    %cst_32 = arith.constant dense<0.000000e+00> : vector<16xf32>
    %55 = vector.multi_reduction <add>, %54, %cst_32 [0] : vector<8x16xf32> to vector<16xf32>
    %56 = vector.shape_cast %55 : vector<16xf32> to vector<1x16xf32>
    %57 = tpu.reciprocal %56 {approx = true} : vector<1x16xf32> -> vector<1x16xf32>
    %58 = vector.broadcast %57 : vector<1x16xf32> to vector<8x16xf32>
    %59 = arith.mulf %54, %58 : vector<8x16xf32>
    %c0_33 = arith.constant 0 : index
    %c0_34 = arith.constant 0 : index
    %c0_35 = arith.constant 0 : index
    %60 = vector.load %arg17[%c0_33, %c0_34, %c0_35] : memref<1x8x16xf32, #tpu.memory_space<vmem>>, vector<1x8x16xf32>
    %61 = vector.shape_cast %60 : vector<1x8x16xf32> to vector<8x16xf32>
    %62 = vector.shape_cast %59 : vector<8x16xf32> to vector<1x8x16xf32>
    tpu.vector_store %arg17[%c0_33, %c0_34, %c0_35], %62 {strides = array<i32>} : memref<1x8x16xf32, #tpu.memory_space<vmem>>, vector<1x8x16xf32>,
    %63 = vector.extract_strided_slice %14 {offsets = [0, 0], sizes = [1, 16], strides = [1, 1]} : vector<4x16xf32> to vector<1x16xf32>
    %64 = vector.extract_strided_slice %17 {offsets = [0, 0, 0], sizes = [1, 8, 16], strides = [1, 1, 1]} : vector<4x8x16xf32> to vector<1x8x16xf32>
    %65 = vector.shape_cast %64 : vector<1x8x16xf32> to vector<8x16xf32>
    %66 = vector.broadcast %63 : vector<1x16xf32> to vector<8x16xf32>
    %67 = arith.mulf %66, %65 : vector<8x16xf32>
    %68 = vector.extract_strided_slice %14 {offsets = [1, 0], sizes = [1, 16], strides = [1, 1]} : vector<4x16xf32> to vector<1x16xf32>
    %69 = vector.extract_strided_slice %17 {offsets = [1, 0, 0], sizes = [1, 8, 16], strides = [1, 1, 1]} : vector<4x8x16xf32> to vector<1x8x16xf32>
    %70 = vector.shape_cast %69 : vector<1x8x16xf32> to vector<8x16xf32>
    %71 = vector.broadcast %68 : vector<1x16xf32> to vector<8x16xf32>
    %72 = arith.mulf %71, %70 : vector<8x16xf32>
    %73 = arith.addf %67, %72 : vector<8x16xf32>
    %74 = vector.extract_strided_slice %14 {offsets = [2, 0], sizes = [1, 16], strides = [1, 1]} : vector<4x16xf32> to vector<1x16xf32>
    %75 = vector.extract_strided_slice %17 {offsets = [2, 0, 0], sizes = [1, 8, 16], strides = [1, 1, 1]} : vector<4x8x16xf32> to vector<1x8x16xf32>
    %76 = vector.shape_cast %75 : vector<1x8x16xf32> to vector<8x16xf32>
    %77 = vector.broadcast %74 : vector<1x16xf32> to vector<8x16xf32>
    %78 = arith.mulf %77, %76 : vector<8x16xf32>
    %79 = arith.addf %73, %78 : vector<8x16xf32>
    %80 = vector.extract_strided_slice %14 {offsets = [3, 0], sizes = [1, 16], strides = [1, 1]} : vector<4x16xf32> to vector<1x16xf32>
    %81 = vector.extract_strided_slice %17 {offsets = [3, 0, 0], sizes = [1, 8, 16], strides = [1, 1, 1]} : vector<4x8x16xf32> to vector<1x8x16xf32>
    %82 = vector.shape_cast %81 : vector<1x8x16xf32> to vector<8x16xf32>
    %83 = vector.broadcast %80 : vector<1x16xf32> to vector<8x16xf32>
    %84 = arith.mulf %83, %82 : vector<8x16xf32>
    %85 = arith.addf %79, %84 : vector<8x16xf32>
    %cst_36 = arith.constant dense<0xFF800000> : vector<16xf32>
    %86 = vector.multi_reduction <maximumf>, %85, %cst_36 [0] : vector<8x16xf32> to vector<16xf32>
    %87 = vector.shape_cast %86 : vector<16xf32> to vector<1x16xf32>
    %88 = vector.broadcast %87 : vector<1x16xf32> to vector<8x16xf32>
    %89 = arith.subf %85, %88 : vector<8x16xf32>
    %90 = math.exp %89 : vector<8x16xf32>
    %cst_37 = arith.constant dense<0.000000e+00> : vector<16xf32>
    %91 = vector.multi_reduction <add>, %90, %cst_37 [0] : vector<8x16xf32> to vector<16xf32>
    %92 = vector.shape_cast %91 : vector<16xf32> to vector<1x16xf32>
    %93 = tpu.reciprocal %92 {approx = true} : vector<1x16xf32> -> vector<1x16xf32>
    %94 = vector.broadcast %93 : vector<1x16xf32> to vector<8x16xf32>
    %95 = arith.mulf %90, %94 : vector<8x16xf32>
    %96 = vector.shape_cast %59 : vector<8x16xf32> to vector<1x8x16xf32>
    %97 = vector.broadcast %96 : vector<1x8x16xf32> to vector<4x8x16xf32>
    %98 = arith.mulf %97, %8 : vector<4x8x16xf32>
    %cst_38 = arith.constant dense<0.000000e+00> : vector<4x16xf32>
    %99 = vector.multi_reduction <add>, %98, %cst_38 [1] : vector<4x8x16xf32> to vector<4x16xf32>
    %c0_39 = arith.constant 0 : index
    %c0_40 = arith.constant 0 : index
    %c0_41 = arith.constant 0 : index
    %100 = vector.load %arg15[%c0_39, %c0_40, %c0_41] : memref<1x8x16xf32, #tpu.memory_space<vmem>>, vector<1x4x16xf32>
    %101 = vector.shape_cast %100 : vector<1x4x16xf32> to vector<4x16xf32>
    %102 = vector.shape_cast %99 : vector<4x16xf32> to vector<1x4x16xf32>
    tpu.vector_store %arg15[%c0_39, %c0_40, %c0_41], %102 {strides = array<i32>} : memref<1x8x16xf32, #tpu.memory_space<vmem>>, vector<1x4x16xf32>,
    %c0_42 = arith.constant 0 : index
    %c0_43 = arith.constant 0 : index
    %103 = memref.load %arg2[%c0_42, %c0_43] : memref<4x8xf32, #tpu.memory_space<smem>>
    %104 = vector.extract_strided_slice %11 {offsets = [0, 0, 0], sizes = [1, 8, 16], strides = [1, 1, 1]} : vector<8x8x16xf32> to vector<1x8x16xf32>
    %105 = vector.shape_cast %104 : vector<1x8x16xf32> to vector<8x16xf32>
    %106 = vector.broadcast %103 : f32 to vector<8x16xf32>
    %107 = arith.mulf %106, %105 : vector<8x16xf32>
    %c0_44 = arith.constant 0 : index
    %c1 = arith.constant 1 : index
    %108 = memref.load %arg2[%c0_44, %c1] : memref<4x8xf32, #tpu.memory_space<smem>>
    %109 = vector.extract_strided_slice %11 {offsets = [1, 0, 0], sizes = [1, 8, 16], strides = [1, 1, 1]} : vector<8x8x16xf32> to vector<1x8x16xf32>
    %110 = vector.shape_cast %109 : vector<1x8x16xf32> to vector<8x16xf32>
    %111 = vector.broadcast %108 : f32 to vector<8x16xf32>
    %112 = arith.mulf %111, %110 : vector<8x16xf32>
    %113 = arith.addf %107, %112 : vector<8x16xf32>
    %c0_45 = arith.constant 0 : index
    %c2 = arith.constant 2 : index
    %114 = memref.load %arg2[%c0_45, %c2] : memref<4x8xf32, #tpu.memory_space<smem>>
    %115 = vector.extract_strided_slice %11 {offsets = [2, 0, 0], sizes = [1, 8, 16], strides = [1, 1, 1]} : vector<8x8x16xf32> to vector<1x8x16xf32>
    %116 = vector.shape_cast %115 : vector<1x8x16xf32> to vector<8x16xf32>
    %117 = vector.broadcast %114 : f32 to vector<8x16xf32>
    %118 = arith.mulf %117, %116 : vector<8x16xf32>
    %119 = arith.addf %113, %118 : vector<8x16xf32>
    %c0_46 = arith.constant 0 : index
    %c3 = arith.constant 3 : index
    %120 = memref.load %arg2[%c0_46, %c3] : memref<4x8xf32, #tpu.memory_space<smem>>
    %121 = vector.extract_strided_slice %11 {offsets = [3, 0, 0], sizes = [1, 8, 16], strides = [1, 1, 1]} : vector<8x8x16xf32> to vector<1x8x16xf32>
    %122 = vector.shape_cast %121 : vector<1x8x16xf32> to vector<8x16xf32>
    %123 = vector.broadcast %120 : f32 to vector<8x16xf32>
    %124 = arith.mulf %123, %122 : vector<8x16xf32>
    %125 = arith.addf %119, %124 : vector<8x16xf32>
    %c0_47 = arith.constant 0 : index
    %c4 = arith.constant 4 : index
    %126 = memref.load %arg2[%c0_47, %c4] : memref<4x8xf32, #tpu.memory_space<smem>>
    %127 = vector.extract_strided_slice %11 {offsets = [4, 0, 0], sizes = [1, 8, 16], strides = [1, 1, 1]} : vector<8x8x16xf32> to vector<1x8x16xf32>
    %128 = vector.shape_cast %127 : vector<1x8x16xf32> to vector<8x16xf32>
    %129 = vector.broadcast %126 : f32 to vector<8x16xf32>
    %130 = arith.mulf %129, %128 : vector<8x16xf32>
    %131 = arith.addf %125, %130 : vector<8x16xf32>
    %c0_48 = arith.constant 0 : index
    %c5 = arith.constant 5 : index
    %132 = memref.load %arg2[%c0_48, %c5] : memref<4x8xf32, #tpu.memory_space<smem>>
    %133 = vector.extract_strided_slice %11 {offsets = [5, 0, 0], sizes = [1, 8, 16], strides = [1, 1, 1]} : vector<8x8x16xf32> to vector<1x8x16xf32>
    %134 = vector.shape_cast %133 : vector<1x8x16xf32> to vector<8x16xf32>
    %135 = vector.broadcast %132 : f32 to vector<8x16xf32>
    %136 = arith.mulf %135, %134 : vector<8x16xf32>
    %137 = arith.addf %131, %136 : vector<8x16xf32>
    %c0_49 = arith.constant 0 : index
    %c6 = arith.constant 6 : index
    %138 = memref.load %arg2[%c0_49, %c6] : memref<4x8xf32, #tpu.memory_space<smem>>
    %139 = vector.extract_strided_slice %11 {offsets = [6, 0, 0], sizes = [1, 8, 16], strides = [1, 1, 1]} : vector<8x8x16xf32> to vector<1x8x16xf32>
    %140 = vector.shape_cast %139 : vector<1x8x16xf32> to vector<8x16xf32>
    %141 = vector.broadcast %138 : f32 to vector<8x16xf32>
    %142 = arith.mulf %141, %140 : vector<8x16xf32>
    %143 = arith.addf %137, %142 : vector<8x16xf32>
    %c0_50 = arith.constant 0 : index
    %c7 = arith.constant 7 : index
    %144 = memref.load %arg2[%c0_50, %c7] : memref<4x8xf32, #tpu.memory_space<smem>>
    %145 = vector.extract_strided_slice %11 {offsets = [7, 0, 0], sizes = [1, 8, 16], strides = [1, 1, 1]} : vector<8x8x16xf32> to vector<1x8x16xf32>
    %146 = vector.shape_cast %145 : vector<1x8x16xf32> to vector<8x16xf32>
    %147 = vector.broadcast %144 : f32 to vector<8x16xf32>
    %148 = arith.mulf %147, %146 : vector<8x16xf32>
    %149 = arith.addf %143, %148 : vector<8x16xf32>
    %c0_51 = arith.constant 0 : index
    %150 = memref.load %arg3[%c0_51] : memref<4xf32, #tpu.memory_space<smem>>
    %151 = vector.broadcast %150 : f32 to vector<8x16xf32>
    %152 = arith.addf %149, %151 : vector<8x16xf32>
    %cst_52 = arith.constant 0.000000e+00 : f32
    %153 = vector.broadcast %cst_52 : f32 to vector<8x16xf32>
    %154 = arith.maximumf %152, %153 : vector<8x16xf32>
    %155 = arith.mulf %59, %154 : vector<8x16xf32>
    %cst_53 = arith.constant dense<0.000000e+00> : vector<16xf32>
    %156 = vector.multi_reduction <add>, %155, %cst_53 [0] : vector<8x16xf32> to vector<16xf32>
    %157 = vector.shape_cast %156 : vector<16xf32> to vector<1x16xf32>
    %c1_54 = arith.constant 1 : index
    %c0_55 = arith.constant 0 : index
    %158 = memref.load %arg2[%c1_54, %c0_55] : memref<4x8xf32, #tpu.memory_space<smem>>
    %159 = vector.extract_strided_slice %11 {offsets = [0, 0, 0], sizes = [1, 8, 16], strides = [1, 1, 1]} : vector<8x8x16xf32> to vector<1x8x16xf32>
    %160 = vector.shape_cast %159 : vector<1x8x16xf32> to vector<8x16xf32>
    %161 = vector.broadcast %158 : f32 to vector<8x16xf32>
    %162 = arith.mulf %161, %160 : vector<8x16xf32>
    %c1_56 = arith.constant 1 : index
    %c1_57 = arith.constant 1 : index
    %163 = memref.load %arg2[%c1_56, %c1_57] : memref<4x8xf32, #tpu.memory_space<smem>>
    %164 = vector.extract_strided_slice %11 {offsets = [1, 0, 0], sizes = [1, 8, 16], strides = [1, 1, 1]} : vector<8x8x16xf32> to vector<1x8x16xf32>
    %165 = vector.shape_cast %164 : vector<1x8x16xf32> to vector<8x16xf32>
    %166 = vector.broadcast %163 : f32 to vector<8x16xf32>
    %167 = arith.mulf %166, %165 : vector<8x16xf32>
    %168 = arith.addf %162, %167 : vector<8x16xf32>
    %c1_58 = arith.constant 1 : index
    %c2_59 = arith.constant 2 : index
    %169 = memref.load %arg2[%c1_58, %c2_59] : memref<4x8xf32, #tpu.memory_space<smem>>
    %170 = vector.extract_strided_slice %11 {offsets = [2, 0, 0], sizes = [1, 8, 16], strides = [1, 1, 1]} : vector<8x8x16xf32> to vector<1x8x16xf32>
    %171 = vector.shape_cast %170 : vector<1x8x16xf32> to vector<8x16xf32>
    %172 = vector.broadcast %169 : f32 to vector<8x16xf32>
    %173 = arith.mulf %172, %171 : vector<8x16xf32>
    %174 = arith.addf %168, %173 : vector<8x16xf32>
    %c1_60 = arith.constant 1 : index
    %c3_61 = arith.constant 3 : index
    %175 = memref.load %arg2[%c1_60, %c3_61] : memref<4x8xf32, #tpu.memory_space<smem>>
    %176 = vector.extract_strided_slice %11 {offsets = [3, 0, 0], sizes = [1, 8, 16], strides = [1, 1, 1]} : vector<8x8x16xf32> to vector<1x8x16xf32>
    %177 = vector.shape_cast %176 : vector<1x8x16xf32> to vector<8x16xf32>
    %178 = vector.broadcast %175 : f32 to vector<8x16xf32>
    %179 = arith.mulf %178, %177 : vector<8x16xf32>
    %180 = arith.addf %174, %179 : vector<8x16xf32>
    %c1_62 = arith.constant 1 : index
    %c4_63 = arith.constant 4 : index
    %181 = memref.load %arg2[%c1_62, %c4_63] : memref<4x8xf32, #tpu.memory_space<smem>>
    %182 = vector.extract_strided_slice %11 {offsets = [4, 0, 0], sizes = [1, 8, 16], strides = [1, 1, 1]} : vector<8x8x16xf32> to vector<1x8x16xf32>
    %183 = vector.shape_cast %182 : vector<1x8x16xf32> to vector<8x16xf32>
    %184 = vector.broadcast %181 : f32 to vector<8x16xf32>
    %185 = arith.mulf %184, %183 : vector<8x16xf32>
    %186 = arith.addf %180, %185 : vector<8x16xf32>
    %c1_64 = arith.constant 1 : index
    %c5_65 = arith.constant 5 : index
    %187 = memref.load %arg2[%c1_64, %c5_65] : memref<4x8xf32, #tpu.memory_space<smem>>
    %188 = vector.extract_strided_slice %11 {offsets = [5, 0, 0], sizes = [1, 8, 16], strides = [1, 1, 1]} : vector<8x8x16xf32> to vector<1x8x16xf32>
    %189 = vector.shape_cast %188 : vector<1x8x16xf32> to vector<8x16xf32>
    %190 = vector.broadcast %187 : f32 to vector<8x16xf32>
    %191 = arith.mulf %190, %189 : vector<8x16xf32>
    %192 = arith.addf %186, %191 : vector<8x16xf32>
    %c1_66 = arith.constant 1 : index
    %c6_67 = arith.constant 6 : index
    %193 = memref.load %arg2[%c1_66, %c6_67] : memref<4x8xf32, #tpu.memory_space<smem>>
    %194 = vector.extract_strided_slice %11 {offsets = [6, 0, 0], sizes = [1, 8, 16], strides = [1, 1, 1]} : vector<8x8x16xf32> to vector<1x8x16xf32>
    %195 = vector.shape_cast %194 : vector<1x8x16xf32> to vector<8x16xf32>
    %196 = vector.broadcast %193 : f32 to vector<8x16xf32>
    %197 = arith.mulf %196, %195 : vector<8x16xf32>
    %198 = arith.addf %192, %197 : vector<8x16xf32>
    %c1_68 = arith.constant 1 : index
    %c7_69 = arith.constant 7 : index
    %199 = memref.load %arg2[%c1_68, %c7_69] : memref<4x8xf32, #tpu.memory_space<smem>>
    %200 = vector.extract_strided_slice %11 {offsets = [7, 0, 0], sizes = [1, 8, 16], strides = [1, 1, 1]} : vector<8x8x16xf32> to vector<1x8x16xf32>
    %201 = vector.shape_cast %200 : vector<1x8x16xf32> to vector<8x16xf32>
    %202 = vector.broadcast %199 : f32 to vector<8x16xf32>
    %203 = arith.mulf %202, %201 : vector<8x16xf32>
    %204 = arith.addf %198, %203 : vector<8x16xf32>
    %c1_70 = arith.constant 1 : index
    %205 = memref.load %arg3[%c1_70] : memref<4xf32, #tpu.memory_space<smem>>
    %206 = vector.broadcast %205 : f32 to vector<8x16xf32>
    %207 = arith.addf %204, %206 : vector<8x16xf32>
    %cst_71 = arith.constant 0.000000e+00 : f32
    %208 = vector.broadcast %cst_71 : f32 to vector<8x16xf32>
    %209 = arith.maximumf %207, %208 : vector<8x16xf32>
    %210 = arith.mulf %59, %209 : vector<8x16xf32>
    %cst_72 = arith.constant dense<0.000000e+00> : vector<16xf32>
    %211 = vector.multi_reduction <add>, %210, %cst_72 [0] : vector<8x16xf32> to vector<16xf32>
    %212 = vector.shape_cast %211 : vector<16xf32> to vector<1x16xf32>
    %c2_73 = arith.constant 2 : index
    %c0_74 = arith.constant 0 : index
    %213 = memref.load %arg2[%c2_73, %c0_74] : memref<4x8xf32, #tpu.memory_space<smem>>
    %214 = vector.extract_strided_slice %11 {offsets = [0, 0, 0], sizes = [1, 8, 16], strides = [1, 1, 1]} : vector<8x8x16xf32> to vector<1x8x16xf32>
    %215 = vector.shape_cast %214 : vector<1x8x16xf32> to vector<8x16xf32>
    %216 = vector.broadcast %213 : f32 to vector<8x16xf32>
    %217 = arith.mulf %216, %215 : vector<8x16xf32>
    %c2_75 = arith.constant 2 : index
    %c1_76 = arith.constant 1 : index
    %218 = memref.load %arg2[%c2_75, %c1_76] : memref<4x8xf32, #tpu.memory_space<smem>>
    %219 = vector.extract_strided_slice %11 {offsets = [1, 0, 0], sizes = [1, 8, 16], strides = [1, 1, 1]} : vector<8x8x16xf32> to vector<1x8x16xf32>
    %220 = vector.shape_cast %219 : vector<1x8x16xf32> to vector<8x16xf32>
    %221 = vector.broadcast %218 : f32 to vector<8x16xf32>
    %222 = arith.mulf %221, %220 : vector<8x16xf32>
    %223 = arith.addf %217, %222 : vector<8x16xf32>
    %c2_77 = arith.constant 2 : index
    %c2_78 = arith.constant 2 : index
    %224 = memref.load %arg2[%c2_77, %c2_78] : memref<4x8xf32, #tpu.memory_space<smem>>
    %225 = vector.extract_strided_slice %11 {offsets = [2, 0, 0], sizes = [1, 8, 16], strides = [1, 1, 1]} : vector<8x8x16xf32> to vector<1x8x16xf32>
    %226 = vector.shape_cast %225 : vector<1x8x16xf32> to vector<8x16xf32>
    %227 = vector.broadcast %224 : f32 to vector<8x16xf32>
    %228 = arith.mulf %227, %226 : vector<8x16xf32>
    %229 = arith.addf %223, %228 : vector<8x16xf32>
    %c2_79 = arith.constant 2 : index
    %c3_80 = arith.constant 3 : index
    %230 = memref.load %arg2[%c2_79, %c3_80] : memref<4x8xf32, #tpu.memory_space<smem>>
    %231 = vector.extract_strided_slice %11 {offsets = [3, 0, 0], sizes = [1, 8, 16], strides = [1, 1, 1]} : vector<8x8x16xf32> to vector<1x8x16xf32>
    %232 = vector.shape_cast %231 : vector<1x8x16xf32> to vector<8x16xf32>
    %233 = vector.broadcast %230 : f32 to vector<8x16xf32>
    %234 = arith.mulf %233, %232 : vector<8x16xf32>
    %235 = arith.addf %229, %234 : vector<8x16xf32>
    %c2_81 = arith.constant 2 : index
    %c4_82 = arith.constant 4 : index
    %236 = memref.load %arg2[%c2_81, %c4_82] : memref<4x8xf32, #tpu.memory_space<smem>>
    %237 = vector.extract_strided_slice %11 {offsets = [4, 0, 0], sizes = [1, 8, 16], strides = [1, 1, 1]} : vector<8x8x16xf32> to vector<1x8x16xf32>
    %238 = vector.shape_cast %237 : vector<1x8x16xf32> to vector<8x16xf32>
    %239 = vector.broadcast %236 : f32 to vector<8x16xf32>
    %240 = arith.mulf %239, %238 : vector<8x16xf32>
    %241 = arith.addf %235, %240 : vector<8x16xf32>
    %c2_83 = arith.constant 2 : index
    %c5_84 = arith.constant 5 : index
    %242 = memref.load %arg2[%c2_83, %c5_84] : memref<4x8xf32, #tpu.memory_space<smem>>
    %243 = vector.extract_strided_slice %11 {offsets = [5, 0, 0], sizes = [1, 8, 16], strides = [1, 1, 1]} : vector<8x8x16xf32> to vector<1x8x16xf32>
    %244 = vector.shape_cast %243 : vector<1x8x16xf32> to vector<8x16xf32>
    %245 = vector.broadcast %242 : f32 to vector<8x16xf32>
    %246 = arith.mulf %245, %244 : vector<8x16xf32>
    %247 = arith.addf %241, %246 : vector<8x16xf32>
    %c2_85 = arith.constant 2 : index
    %c6_86 = arith.constant 6 : index
    %248 = memref.load %arg2[%c2_85, %c6_86] : memref<4x8xf32, #tpu.memory_space<smem>>
    %249 = vector.extract_strided_slice %11 {offsets = [6, 0, 0], sizes = [1, 8, 16], strides = [1, 1, 1]} : vector<8x8x16xf32> to vector<1x8x16xf32>
    %250 = vector.shape_cast %249 : vector<1x8x16xf32> to vector<8x16xf32>
    %251 = vector.broadcast %248 : f32 to vector<8x16xf32>
    %252 = arith.mulf %251, %250 : vector<8x16xf32>
    %253 = arith.addf %247, %252 : vector<8x16xf32>
    %c2_87 = arith.constant 2 : index
    %c7_88 = arith.constant 7 : index
    %254 = memref.load %arg2[%c2_87, %c7_88] : memref<4x8xf32, #tpu.memory_space<smem>>
    %255 = vector.extract_strided_slice %11 {offsets = [7, 0, 0], sizes = [1, 8, 16], strides = [1, 1, 1]} : vector<8x8x16xf32> to vector<1x8x16xf32>
    %256 = vector.shape_cast %255 : vector<1x8x16xf32> to vector<8x16xf32>
    %257 = vector.broadcast %254 : f32 to vector<8x16xf32>
    %258 = arith.mulf %257, %256 : vector<8x16xf32>
    %259 = arith.addf %253, %258 : vector<8x16xf32>
    %c2_89 = arith.constant 2 : index
    %260 = memref.load %arg3[%c2_89] : memref<4xf32, #tpu.memory_space<smem>>
    %261 = vector.broadcast %260 : f32 to vector<8x16xf32>
    %262 = arith.addf %259, %261 : vector<8x16xf32>
    %cst_90 = arith.constant 0.000000e+00 : f32
    %263 = vector.broadcast %cst_90 : f32 to vector<8x16xf32>
    %264 = arith.maximumf %262, %263 : vector<8x16xf32>
    %265 = arith.mulf %59, %264 : vector<8x16xf32>
    %cst_91 = arith.constant dense<0.000000e+00> : vector<16xf32>
    %266 = vector.multi_reduction <add>, %265, %cst_91 [0] : vector<8x16xf32> to vector<16xf32>
    %267 = vector.shape_cast %266 : vector<16xf32> to vector<1x16xf32>
    %c3_92 = arith.constant 3 : index
    %c0_93 = arith.constant 0 : index
    %268 = memref.load %arg2[%c3_92, %c0_93] : memref<4x8xf32, #tpu.memory_space<smem>>
    %269 = vector.extract_strided_slice %11 {offsets = [0, 0, 0], sizes = [1, 8, 16], strides = [1, 1, 1]} : vector<8x8x16xf32> to vector<1x8x16xf32>
    %270 = vector.shape_cast %269 : vector<1x8x16xf32> to vector<8x16xf32>
    %271 = vector.broadcast %268 : f32 to vector<8x16xf32>
    %272 = arith.mulf %271, %270 : vector<8x16xf32>
    %c3_94 = arith.constant 3 : index
    %c1_95 = arith.constant 1 : index
    %273 = memref.load %arg2[%c3_94, %c1_95] : memref<4x8xf32, #tpu.memory_space<smem>>
    %274 = vector.extract_strided_slice %11 {offsets = [1, 0, 0], sizes = [1, 8, 16], strides = [1, 1, 1]} : vector<8x8x16xf32> to vector<1x8x16xf32>
    %275 = vector.shape_cast %274 : vector<1x8x16xf32> to vector<8x16xf32>
    %276 = vector.broadcast %273 : f32 to vector<8x16xf32>
    %277 = arith.mulf %276, %275 : vector<8x16xf32>
    %278 = arith.addf %272, %277 : vector<8x16xf32>
    %c3_96 = arith.constant 3 : index
    %c2_97 = arith.constant 2 : index
    %279 = memref.load %arg2[%c3_96, %c2_97] : memref<4x8xf32, #tpu.memory_space<smem>>
    %280 = vector.extract_strided_slice %11 {offsets = [2, 0, 0], sizes = [1, 8, 16], strides = [1, 1, 1]} : vector<8x8x16xf32> to vector<1x8x16xf32>
    %281 = vector.shape_cast %280 : vector<1x8x16xf32> to vector<8x16xf32>
    %282 = vector.broadcast %279 : f32 to vector<8x16xf32>
    %283 = arith.mulf %282, %281 : vector<8x16xf32>
    %284 = arith.addf %278, %283 : vector<8x16xf32>
    %c3_98 = arith.constant 3 : index
    %c3_99 = arith.constant 3 : index
    %285 = memref.load %arg2[%c3_98, %c3_99] : memref<4x8xf32, #tpu.memory_space<smem>>
    %286 = vector.extract_strided_slice %11 {offsets = [3, 0, 0], sizes = [1, 8, 16], strides = [1, 1, 1]} : vector<8x8x16xf32> to vector<1x8x16xf32>
    %287 = vector.shape_cast %286 : vector<1x8x16xf32> to vector<8x16xf32>
    %288 = vector.broadcast %285 : f32 to vector<8x16xf32>
    %289 = arith.mulf %288, %287 : vector<8x16xf32>
    %290 = arith.addf %284, %289 : vector<8x16xf32>
    %c3_100 = arith.constant 3 : index
    %c4_101 = arith.constant 4 : index
    %291 = memref.load %arg2[%c3_100, %c4_101] : memref<4x8xf32, #tpu.memory_space<smem>>
    %292 = vector.extract_strided_slice %11 {offsets = [4, 0, 0], sizes = [1, 8, 16], strides = [1, 1, 1]} : vector<8x8x16xf32> to vector<1x8x16xf32>
    %293 = vector.shape_cast %292 : vector<1x8x16xf32> to vector<8x16xf32>
    %294 = vector.broadcast %291 : f32 to vector<8x16xf32>
    %295 = arith.mulf %294, %293 : vector<8x16xf32>
    %296 = arith.addf %290, %295 : vector<8x16xf32>
    %c3_102 = arith.constant 3 : index
    %c5_103 = arith.constant 5 : index
    %297 = memref.load %arg2[%c3_102, %c5_103] : memref<4x8xf32, #tpu.memory_space<smem>>
    %298 = vector.extract_strided_slice %11 {offsets = [5, 0, 0], sizes = [1, 8, 16], strides = [1, 1, 1]} : vector<8x8x16xf32> to vector<1x8x16xf32>
    %299 = vector.shape_cast %298 : vector<1x8x16xf32> to vector<8x16xf32>
    %300 = vector.broadcast %297 : f32 to vector<8x16xf32>
    %301 = arith.mulf %300, %299 : vector<8x16xf32>
    %302 = arith.addf %296, %301 : vector<8x16xf32>
    %c3_104 = arith.constant 3 : index
    %c6_105 = arith.constant 6 : index
    %303 = memref.load %arg2[%c3_104, %c6_105] : memref<4x8xf32, #tpu.memory_space<smem>>
    %304 = vector.extract_strided_slice %11 {offsets = [6, 0, 0], sizes = [1, 8, 16], strides = [1, 1, 1]} : vector<8x8x16xf32> to vector<1x8x16xf32>
    %305 = vector.shape_cast %304 : vector<1x8x16xf32> to vector<8x16xf32>
    %306 = vector.broadcast %303 : f32 to vector<8x16xf32>
    %307 = arith.mulf %306, %305 : vector<8x16xf32>
    %308 = arith.addf %302, %307 : vector<8x16xf32>
    %c3_106 = arith.constant 3 : index
    %c7_107 = arith.constant 7 : index
    %309 = memref.load %arg2[%c3_106, %c7_107] : memref<4x8xf32, #tpu.memory_space<smem>>
    %310 = vector.extract_strided_slice %11 {offsets = [7, 0, 0], sizes = [1, 8, 16], strides = [1, 1, 1]} : vector<8x8x16xf32> to vector<1x8x16xf32>
    %311 = vector.shape_cast %310 : vector<1x8x16xf32> to vector<8x16xf32>
    %312 = vector.broadcast %309 : f32 to vector<8x16xf32>
    %313 = arith.mulf %312, %311 : vector<8x16xf32>
    %314 = arith.addf %308, %313 : vector<8x16xf32>
    %c3_108 = arith.constant 3 : index
    %315 = memref.load %arg3[%c3_108] : memref<4xf32, #tpu.memory_space<smem>>
    %316 = vector.broadcast %315 : f32 to vector<8x16xf32>
    %317 = arith.addf %314, %316 : vector<8x16xf32>
    %cst_109 = arith.constant 0.000000e+00 : f32
    %318 = vector.broadcast %cst_109 : f32 to vector<8x16xf32>
    %319 = arith.maximumf %317, %318 : vector<8x16xf32>
    %320 = arith.mulf %59, %319 : vector<8x16xf32>
    %cst_110 = arith.constant dense<0.000000e+00> : vector<16xf32>
    %321 = vector.multi_reduction <add>, %320, %cst_110 [0] : vector<8x16xf32> to vector<16xf32>
    %322 = vector.shape_cast %321 : vector<16xf32> to vector<1x16xf32>
    %323 = tpu.concatenate %157, %212, %267, %322 in 0 : vector<1x16xf32>, vector<1x16xf32>, vector<1x16xf32>, vector<1x16xf32> -> vector<4x16xf32>
    %c0_111 = arith.constant 0 : index
    %c4_112 = arith.constant 4 : index
    %c0_113 = arith.constant 0 : index
    %324 = vector.load %arg15[%c0_111, %c4_112, %c0_113] : memref<1x8x16xf32, #tpu.memory_space<vmem>>, vector<1x4x16xf32>
    %325 = vector.shape_cast %324 : vector<1x4x16xf32> to vector<4x16xf32>
    %326 = vector.shape_cast %323 : vector<4x16xf32> to vector<1x4x16xf32>
    tpu.vector_store %arg15[%c0_111, %c4_112, %c0_113], %326 {strides = array<i32>} : memref<1x8x16xf32, #tpu.memory_space<vmem>>, vector<1x4x16xf32>,
    %327 = vector.shape_cast %95 : vector<8x16xf32> to vector<1x8x16xf32>
    %328 = vector.broadcast %327 : vector<1x8x16xf32> to vector<4x8x16xf32>
    %329 = arith.mulf %328, %20 : vector<4x8x16xf32>
    %cst_114 = arith.constant dense<0.000000e+00> : vector<4x16xf32>
    %330 = vector.multi_reduction <add>, %329, %cst_114 [1] : vector<4x8x16xf32> to vector<4x16xf32>
    %c0_115 = arith.constant 0 : index
    %c0_116 = arith.constant 0 : index
    %c0_117 = arith.constant 0 : index
    %331 = vector.load %arg16[%c0_115, %c0_116, %c0_117] : memref<1x8x16xf32, #tpu.memory_space<vmem>>, vector<1x4x16xf32>
    %332 = vector.shape_cast %331 : vector<1x4x16xf32> to vector<4x16xf32>
    %333 = vector.shape_cast %330 : vector<4x16xf32> to vector<1x4x16xf32>
    tpu.vector_store %arg16[%c0_115, %c0_116, %c0_117], %333 {strides = array<i32>} : memref<1x8x16xf32, #tpu.memory_space<vmem>>, vector<1x4x16xf32>,
    %334 = vector.extract_strided_slice %26 {offsets = [0, 0], sizes = [1, 16], strides = [1, 1]} : vector<3x16xf32> to vector<1x16xf32>
    %335 = vector.extract_strided_slice %26 {offsets = [1, 0], sizes = [1, 16], strides = [1, 1]} : vector<3x16xf32> to vector<1x16xf32>
    %336 = vector.extract_strided_slice %26 {offsets = [2, 0], sizes = [1, 16], strides = [1, 1]} : vector<3x16xf32> to vector<1x16xf32>
    %337 = vector.extract_strided_slice %23 {offsets = [0, 0, 0], sizes = [1, 8, 16], strides = [1, 1, 1]} : vector<3x8x16xf32> to vector<1x8x16xf32>
    %338 = vector.shape_cast %337 : vector<1x8x16xf32> to vector<8x16xf32>
    %339 = vector.broadcast %334 : vector<1x16xf32> to vector<8x16xf32>
    %340 = arith.subf %339, %338 : vector<8x16xf32>
    %341 = vector.extract_strided_slice %23 {offsets = [1, 0, 0], sizes = [1, 8, 16], strides = [1, 1, 1]} : vector<3x8x16xf32> to vector<1x8x16xf32>
    %342 = vector.shape_cast %341 : vector<1x8x16xf32> to vector<8x16xf32>
    %343 = vector.broadcast %335 : vector<1x16xf32> to vector<8x16xf32>
    %344 = arith.subf %343, %342 : vector<8x16xf32>
    %345 = vector.extract_strided_slice %23 {offsets = [2, 0, 0], sizes = [1, 8, 16], strides = [1, 1, 1]} : vector<3x8x16xf32> to vector<1x8x16xf32>
    %346 = vector.shape_cast %345 : vector<1x8x16xf32> to vector<8x16xf32>
    %347 = vector.broadcast %336 : vector<1x16xf32> to vector<8x16xf32>
    %348 = arith.subf %347, %346 : vector<8x16xf32>
    %349 = arith.mulf %340, %340 : vector<8x16xf32>
    %350 = arith.mulf %344, %344 : vector<8x16xf32>
    %351 = arith.addf %349, %350 : vector<8x16xf32>
    %352 = arith.mulf %348, %348 : vector<8x16xf32>
    %353 = arith.addf %351, %352 : vector<8x16xf32>
    %354 = math.sqrt %353 : vector<8x16xf32>
    %355 = vector.extract_strided_slice %23 {offsets = [0, 0, 0], sizes = [1, 8, 16], strides = [1, 1, 1]} : vector<3x8x16xf32> to vector<1x8x16xf32>
    %356 = vector.shape_cast %355 : vector<1x8x16xf32> to vector<8x16xf32>
    %357 = vector.extract_strided_slice %23 {offsets = [1, 0, 0], sizes = [1, 8, 16], strides = [1, 1, 1]} : vector<3x8x16xf32> to vector<1x8x16xf32>
    %358 = vector.shape_cast %357 : vector<1x8x16xf32> to vector<8x16xf32>
    %359 = vector.extract_strided_slice %23 {offsets = [2, 0, 0], sizes = [1, 8, 16], strides = [1, 1, 1]} : vector<3x8x16xf32> to vector<1x8x16xf32>
    %360 = vector.shape_cast %359 : vector<1x8x16xf32> to vector<8x16xf32>
    %c0_118 = arith.constant 0 : index
    %c0_119 = arith.constant 0 : index
    %361 = memref.load %arg4[%c0_118, %c0_119] : memref<4x10xf32, #tpu.memory_space<smem>>
    %362 = vector.broadcast %361 : f32 to vector<8x16xf32>
    %363 = arith.mulf %362, %354 : vector<8x16xf32>
    %c0_120 = arith.constant 0 : index
    %c1_121 = arith.constant 1 : index
    %364 = memref.load %arg4[%c0_120, %c1_121] : memref<4x10xf32, #tpu.memory_space<smem>>
    %365 = vector.broadcast %364 : f32 to vector<8x16xf32>
    %366 = arith.mulf %365, %340 : vector<8x16xf32>
    %367 = arith.addf %363, %366 : vector<8x16xf32>
    %c0_122 = arith.constant 0 : index
    %c2_123 = arith.constant 2 : index
    %368 = memref.load %arg4[%c0_122, %c2_123] : memref<4x10xf32, #tpu.memory_space<smem>>
    %369 = vector.broadcast %368 : f32 to vector<8x16xf32>
    %370 = arith.mulf %369, %344 : vector<8x16xf32>
    %371 = arith.addf %367, %370 : vector<8x16xf32>
    %c0_124 = arith.constant 0 : index
    %c3_125 = arith.constant 3 : index
    %372 = memref.load %arg4[%c0_124, %c3_125] : memref<4x10xf32, #tpu.memory_space<smem>>
    %373 = vector.broadcast %372 : f32 to vector<8x16xf32>
    %374 = arith.mulf %373, %348 : vector<8x16xf32>
    %375 = arith.addf %371, %374 : vector<8x16xf32>
    %c0_126 = arith.constant 0 : index
    %c4_127 = arith.constant 4 : index
    %376 = memref.load %arg4[%c0_126, %c4_127] : memref<4x10xf32, #tpu.memory_space<smem>>
    %377 = vector.broadcast %376 : f32 to vector<1x16xf32>
    %378 = arith.mulf %377, %334 : vector<1x16xf32>
    %379 = vector.broadcast %378 : vector<1x16xf32> to vector<8x16xf32>
    %380 = arith.addf %375, %379 : vector<8x16xf32>
    %c0_128 = arith.constant 0 : index
    %c5_129 = arith.constant 5 : index
    %381 = memref.load %arg4[%c0_128, %c5_129] : memref<4x10xf32, #tpu.memory_space<smem>>
    %382 = vector.broadcast %381 : f32 to vector<1x16xf32>
    %383 = arith.mulf %382, %335 : vector<1x16xf32>
    %384 = vector.broadcast %383 : vector<1x16xf32> to vector<8x16xf32>
    %385 = arith.addf %380, %384 : vector<8x16xf32>
    %c0_130 = arith.constant 0 : index
    %c6_131 = arith.constant 6 : index
    %386 = memref.load %arg4[%c0_130, %c6_131] : memref<4x10xf32, #tpu.memory_space<smem>>
    %387 = vector.broadcast %386 : f32 to vector<1x16xf32>
    %388 = arith.mulf %387, %336 : vector<1x16xf32>
    %389 = vector.broadcast %388 : vector<1x16xf32> to vector<8x16xf32>
    %390 = arith.addf %385, %389 : vector<8x16xf32>
    %c0_132 = arith.constant 0 : index
    %c7_133 = arith.constant 7 : index
    %391 = memref.load %arg4[%c0_132, %c7_133] : memref<4x10xf32, #tpu.memory_space<smem>>
    %392 = vector.broadcast %391 : f32 to vector<8x16xf32>
    %393 = arith.mulf %392, %356 : vector<8x16xf32>
    %394 = arith.addf %390, %393 : vector<8x16xf32>
    %c0_134 = arith.constant 0 : index
    %c8 = arith.constant 8 : index
    %395 = memref.load %arg4[%c0_134, %c8] : memref<4x10xf32, #tpu.memory_space<smem>>
    %396 = vector.broadcast %395 : f32 to vector<8x16xf32>
    %397 = arith.mulf %396, %358 : vector<8x16xf32>
    %398 = arith.addf %394, %397 : vector<8x16xf32>
    %c0_135 = arith.constant 0 : index
    %c9 = arith.constant 9 : index
    %399 = memref.load %arg4[%c0_135, %c9] : memref<4x10xf32, #tpu.memory_space<smem>>
    %400 = vector.broadcast %399 : f32 to vector<8x16xf32>
    %401 = arith.mulf %400, %360 : vector<8x16xf32>
    %402 = arith.addf %398, %401 : vector<8x16xf32>
    %c0_136 = arith.constant 0 : index
    %403 = memref.load %arg5[%c0_136] : memref<4xf32, #tpu.memory_space<smem>>
    %404 = vector.broadcast %403 : f32 to vector<8x16xf32>
    %405 = arith.addf %402, %404 : vector<8x16xf32>
    %cst_137 = arith.constant 0.000000e+00 : f32
    %406 = vector.broadcast %cst_137 : f32 to vector<8x16xf32>
    %407 = arith.maximumf %405, %406 : vector<8x16xf32>
    %408 = arith.mulf %95, %407 : vector<8x16xf32>
    %cst_138 = arith.constant dense<0.000000e+00> : vector<16xf32>
    %409 = vector.multi_reduction <add>, %408, %cst_138 [0] : vector<8x16xf32> to vector<16xf32>
    %410 = vector.shape_cast %409 : vector<16xf32> to vector<1x16xf32>
    %c1_139 = arith.constant 1 : index
    %c0_140 = arith.constant 0 : index
    %411 = memref.load %arg4[%c1_139, %c0_140] : memref<4x10xf32, #tpu.memory_space<smem>>
    %412 = vector.broadcast %411 : f32 to vector<8x16xf32>
    %413 = arith.mulf %412, %354 : vector<8x16xf32>
    %c1_141 = arith.constant 1 : index
    %c1_142 = arith.constant 1 : index
    %414 = memref.load %arg4[%c1_141, %c1_142] : memref<4x10xf32, #tpu.memory_space<smem>>
    %415 = vector.broadcast %414 : f32 to vector<8x16xf32>
    %416 = arith.mulf %415, %340 : vector<8x16xf32>
    %417 = arith.addf %413, %416 : vector<8x16xf32>
    %c1_143 = arith.constant 1 : index
    %c2_144 = arith.constant 2 : index
    %418 = memref.load %arg4[%c1_143, %c2_144] : memref<4x10xf32, #tpu.memory_space<smem>>
    %419 = vector.broadcast %418 : f32 to vector<8x16xf32>
    %420 = arith.mulf %419, %344 : vector<8x16xf32>
    %421 = arith.addf %417, %420 : vector<8x16xf32>
    %c1_145 = arith.constant 1 : index
    %c3_146 = arith.constant 3 : index
    %422 = memref.load %arg4[%c1_145, %c3_146] : memref<4x10xf32, #tpu.memory_space<smem>>
    %423 = vector.broadcast %422 : f32 to vector<8x16xf32>
    %424 = arith.mulf %423, %348 : vector<8x16xf32>
    %425 = arith.addf %421, %424 : vector<8x16xf32>
    %c1_147 = arith.constant 1 : index
    %c4_148 = arith.constant 4 : index
    %426 = memref.load %arg4[%c1_147, %c4_148] : memref<4x10xf32, #tpu.memory_space<smem>>
    %427 = vector.broadcast %426 : f32 to vector<1x16xf32>
    %428 = arith.mulf %427, %334 : vector<1x16xf32>
    %429 = vector.broadcast %428 : vector<1x16xf32> to vector<8x16xf32>
    %430 = arith.addf %425, %429 : vector<8x16xf32>
    %c1_149 = arith.constant 1 : index
    %c5_150 = arith.constant 5 : index
    %431 = memref.load %arg4[%c1_149, %c5_150] : memref<4x10xf32, #tpu.memory_space<smem>>
    %432 = vector.broadcast %431 : f32 to vector<1x16xf32>
    %433 = arith.mulf %432, %335 : vector<1x16xf32>
    %434 = vector.broadcast %433 : vector<1x16xf32> to vector<8x16xf32>
    %435 = arith.addf %430, %434 : vector<8x16xf32>
    %c1_151 = arith.constant 1 : index
    %c6_152 = arith.constant 6 : index
    %436 = memref.load %arg4[%c1_151, %c6_152] : memref<4x10xf32, #tpu.memory_space<smem>>
    %437 = vector.broadcast %436 : f32 to vector<1x16xf32>
    %438 = arith.mulf %437, %336 : vector<1x16xf32>
    %439 = vector.broadcast %438 : vector<1x16xf32> to vector<8x16xf32>
    %440 = arith.addf %435, %439 : vector<8x16xf32>
    %c1_153 = arith.constant 1 : index
    %c7_154 = arith.constant 7 : index
    %441 = memref.load %arg4[%c1_153, %c7_154] : memref<4x10xf32, #tpu.memory_space<smem>>
    %442 = vector.broadcast %441 : f32 to vector<8x16xf32>
    %443 = arith.mulf %442, %356 : vector<8x16xf32>
    %444 = arith.addf %440, %443 : vector<8x16xf32>
    %c1_155 = arith.constant 1 : index
    %c8_156 = arith.constant 8 : index
    %445 = memref.load %arg4[%c1_155, %c8_156] : memref<4x10xf32, #tpu.memory_space<smem>>
    %446 = vector.broadcast %445 : f32 to vector<8x16xf32>
    %447 = arith.mulf %446, %358 : vector<8x16xf32>
    %448 = arith.addf %444, %447 : vector<8x16xf32>
    %c1_157 = arith.constant 1 : index
    %c9_158 = arith.constant 9 : index
    %449 = memref.load %arg4[%c1_157, %c9_158] : memref<4x10xf32, #tpu.memory_space<smem>>
    %450 = vector.broadcast %449 : f32 to vector<8x16xf32>
    %451 = arith.mulf %450, %360 : vector<8x16xf32>
    %452 = arith.addf %448, %451 : vector<8x16xf32>
    %c1_159 = arith.constant 1 : index
    %453 = memref.load %arg5[%c1_159] : memref<4xf32, #tpu.memory_space<smem>>
    %454 = vector.broadcast %453 : f32 to vector<8x16xf32>
    %455 = arith.addf %452, %454 : vector<8x16xf32>
    %cst_160 = arith.constant 0.000000e+00 : f32
    %456 = vector.broadcast %cst_160 : f32 to vector<8x16xf32>
    %457 = arith.maximumf %455, %456 : vector<8x16xf32>
    %458 = arith.mulf %95, %457 : vector<8x16xf32>
    %cst_161 = arith.constant dense<0.000000e+00> : vector<16xf32>
    %459 = vector.multi_reduction <add>, %458, %cst_161 [0] : vector<8x16xf32> to vector<16xf32>
    %460 = vector.shape_cast %459 : vector<16xf32> to vector<1x16xf32>
    %c2_162 = arith.constant 2 : index
    %c0_163 = arith.constant 0 : index
    %461 = memref.load %arg4[%c2_162, %c0_163] : memref<4x10xf32, #tpu.memory_space<smem>>
    %462 = vector.broadcast %461 : f32 to vector<8x16xf32>
    %463 = arith.mulf %462, %354 : vector<8x16xf32>
    %c2_164 = arith.constant 2 : index
    %c1_165 = arith.constant 1 : index
    %464 = memref.load %arg4[%c2_164, %c1_165] : memref<4x10xf32, #tpu.memory_space<smem>>
    %465 = vector.broadcast %464 : f32 to vector<8x16xf32>
    %466 = arith.mulf %465, %340 : vector<8x16xf32>
    %467 = arith.addf %463, %466 : vector<8x16xf32>
    %c2_166 = arith.constant 2 : index
    %c2_167 = arith.constant 2 : index
    %468 = memref.load %arg4[%c2_166, %c2_167] : memref<4x10xf32, #tpu.memory_space<smem>>
    %469 = vector.broadcast %468 : f32 to vector<8x16xf32>
    %470 = arith.mulf %469, %344 : vector<8x16xf32>
    %471 = arith.addf %467, %470 : vector<8x16xf32>
    %c2_168 = arith.constant 2 : index
    %c3_169 = arith.constant 3 : index
    %472 = memref.load %arg4[%c2_168, %c3_169] : memref<4x10xf32, #tpu.memory_space<smem>>
    %473 = vector.broadcast %472 : f32 to vector<8x16xf32>
    %474 = arith.mulf %473, %348 : vector<8x16xf32>
    %475 = arith.addf %471, %474 : vector<8x16xf32>
    %c2_170 = arith.constant 2 : index
    %c4_171 = arith.constant 4 : index
    %476 = memref.load %arg4[%c2_170, %c4_171] : memref<4x10xf32, #tpu.memory_space<smem>>
    %477 = vector.broadcast %476 : f32 to vector<1x16xf32>
    %478 = arith.mulf %477, %334 : vector<1x16xf32>
    %479 = vector.broadcast %478 : vector<1x16xf32> to vector<8x16xf32>
    %480 = arith.addf %475, %479 : vector<8x16xf32>
    %c2_172 = arith.constant 2 : index
    %c5_173 = arith.constant 5 : index
    %481 = memref.load %arg4[%c2_172, %c5_173] : memref<4x10xf32, #tpu.memory_space<smem>>
    %482 = vector.broadcast %481 : f32 to vector<1x16xf32>
    %483 = arith.mulf %482, %335 : vector<1x16xf32>
    %484 = vector.broadcast %483 : vector<1x16xf32> to vector<8x16xf32>
    %485 = arith.addf %480, %484 : vector<8x16xf32>
    %c2_174 = arith.constant 2 : index
    %c6_175 = arith.constant 6 : index
    %486 = memref.load %arg4[%c2_174, %c6_175] : memref<4x10xf32, #tpu.memory_space<smem>>
    %487 = vector.broadcast %486 : f32 to vector<1x16xf32>
    %488 = arith.mulf %487, %336 : vector<1x16xf32>
    %489 = vector.broadcast %488 : vector<1x16xf32> to vector<8x16xf32>
    %490 = arith.addf %485, %489 : vector<8x16xf32>
    %c2_176 = arith.constant 2 : index
    %c7_177 = arith.constant 7 : index
    %491 = memref.load %arg4[%c2_176, %c7_177] : memref<4x10xf32, #tpu.memory_space<smem>>
    %492 = vector.broadcast %491 : f32 to vector<8x16xf32>
    %493 = arith.mulf %492, %356 : vector<8x16xf32>
    %494 = arith.addf %490, %493 : vector<8x16xf32>
    %c2_178 = arith.constant 2 : index
    %c8_179 = arith.constant 8 : index
    %495 = memref.load %arg4[%c2_178, %c8_179] : memref<4x10xf32, #tpu.memory_space<smem>>
    %496 = vector.broadcast %495 : f32 to vector<8x16xf32>
    %497 = arith.mulf %496, %358 : vector<8x16xf32>
    %498 = arith.addf %494, %497 : vector<8x16xf32>
    %c2_180 = arith.constant 2 : index
    %c9_181 = arith.constant 9 : index
    %499 = memref.load %arg4[%c2_180, %c9_181] : memref<4x10xf32, #tpu.memory_space<smem>>
    %500 = vector.broadcast %499 : f32 to vector<8x16xf32>
    %501 = arith.mulf %500, %360 : vector<8x16xf32>
    %502 = arith.addf %498, %501 : vector<8x16xf32>
    %c2_182 = arith.constant 2 : index
    %503 = memref.load %arg5[%c2_182] : memref<4xf32, #tpu.memory_space<smem>>
    %504 = vector.broadcast %503 : f32 to vector<8x16xf32>
    %505 = arith.addf %502, %504 : vector<8x16xf32>
    %cst_183 = arith.constant 0.000000e+00 : f32
    %506 = vector.broadcast %cst_183 : f32 to vector<8x16xf32>
    %507 = arith.maximumf %505, %506 : vector<8x16xf32>
    %508 = arith.mulf %95, %507 : vector<8x16xf32>
    %cst_184 = arith.constant dense<0.000000e+00> : vector<16xf32>
    %509 = vector.multi_reduction <add>, %508, %cst_184 [0] : vector<8x16xf32> to vector<16xf32>
    %510 = vector.shape_cast %509 : vector<16xf32> to vector<1x16xf32>
    %c3_185 = arith.constant 3 : index
    %c0_186 = arith.constant 0 : index
    %511 = memref.load %arg4[%c3_185, %c0_186] : memref<4x10xf32, #tpu.memory_space<smem>>
    %512 = vector.broadcast %511 : f32 to vector<8x16xf32>
    %513 = arith.mulf %512, %354 : vector<8x16xf32>
    %c3_187 = arith.constant 3 : index
    %c1_188 = arith.constant 1 : index
    %514 = memref.load %arg4[%c3_187, %c1_188] : memref<4x10xf32, #tpu.memory_space<smem>>
    %515 = vector.broadcast %514 : f32 to vector<8x16xf32>
    %516 = arith.mulf %515, %340 : vector<8x16xf32>
    %517 = arith.addf %513, %516 : vector<8x16xf32>
    %c3_189 = arith.constant 3 : index
    %c2_190 = arith.constant 2 : index
    %518 = memref.load %arg4[%c3_189, %c2_190] : memref<4x10xf32, #tpu.memory_space<smem>>
    %519 = vector.broadcast %518 : f32 to vector<8x16xf32>
    %520 = arith.mulf %519, %344 : vector<8x16xf32>
    %521 = arith.addf %517, %520 : vector<8x16xf32>
    %c3_191 = arith.constant 3 : index
    %c3_192 = arith.constant 3 : index
    %522 = memref.load %arg4[%c3_191, %c3_192] : memref<4x10xf32, #tpu.memory_space<smem>>
    %523 = vector.broadcast %522 : f32 to vector<8x16xf32>
    %524 = arith.mulf %523, %348 : vector<8x16xf32>
    %525 = arith.addf %521, %524 : vector<8x16xf32>
    %c3_193 = arith.constant 3 : index
    %c4_194 = arith.constant 4 : index
    %526 = memref.load %arg4[%c3_193, %c4_194] : memref<4x10xf32, #tpu.memory_space<smem>>
    %527 = vector.broadcast %526 : f32 to vector<1x16xf32>
    %528 = arith.mulf %527, %334 : vector<1x16xf32>
    %529 = vector.broadcast %528 : vector<1x16xf32> to vector<8x16xf32>
    %530 = arith.addf %525, %529 : vector<8x16xf32>
    %c3_195 = arith.constant 3 : index
    %c5_196 = arith.constant 5 : index
    %531 = memref.load %arg4[%c3_195, %c5_196] : memref<4x10xf32, #tpu.memory_space<smem>>
    %532 = vector.broadcast %531 : f32 to vector<1x16xf32>
    %533 = arith.mulf %532, %335 : vector<1x16xf32>
    %534 = vector.broadcast %533 : vector<1x16xf32> to vector<8x16xf32>
    %535 = arith.addf %530, %534 : vector<8x16xf32>
    %c3_197 = arith.constant 3 : index
    %c6_198 = arith.constant 6 : index
    %536 = memref.load %arg4[%c3_197, %c6_198] : memref<4x10xf32, #tpu.memory_space<smem>>
    %537 = vector.broadcast %536 : f32 to vector<1x16xf32>
    %538 = arith.mulf %537, %336 : vector<1x16xf32>
    %539 = vector.broadcast %538 : vector<1x16xf32> to vector<8x16xf32>
    %540 = arith.addf %535, %539 : vector<8x16xf32>
    %c3_199 = arith.constant 3 : index
    %c7_200 = arith.constant 7 : index
    %541 = memref.load %arg4[%c3_199, %c7_200] : memref<4x10xf32, #tpu.memory_space<smem>>
    %542 = vector.broadcast %541 : f32 to vector<8x16xf32>
    %543 = arith.mulf %542, %356 : vector<8x16xf32>
    %544 = arith.addf %540, %543 : vector<8x16xf32>
    %c3_201 = arith.constant 3 : index
    %c8_202 = arith.constant 8 : index
    %545 = memref.load %arg4[%c3_201, %c8_202] : memref<4x10xf32, #tpu.memory_space<smem>>
    %546 = vector.broadcast %545 : f32 to vector<8x16xf32>
    %547 = arith.mulf %546, %358 : vector<8x16xf32>
    %548 = arith.addf %544, %547 : vector<8x16xf32>
    %c3_203 = arith.constant 3 : index
    %c9_204 = arith.constant 9 : index
    %549 = memref.load %arg4[%c3_203, %c9_204] : memref<4x10xf32, #tpu.memory_space<smem>>
    %550 = vector.broadcast %549 : f32 to vector<8x16xf32>
    %551 = arith.mulf %550, %360 : vector<8x16xf32>
    %552 = arith.addf %548, %551 : vector<8x16xf32>
    %c3_205 = arith.constant 3 : index
    %553 = memref.load %arg5[%c3_205] : memref<4xf32, #tpu.memory_space<smem>>
    %554 = vector.broadcast %553 : f32 to vector<8x16xf32>
    %555 = arith.addf %552, %554 : vector<8x16xf32>
    %cst_206 = arith.constant 0.000000e+00 : f32
    %556 = vector.broadcast %cst_206 : f32 to vector<8x16xf32>
    %557 = arith.maximumf %555, %556 : vector<8x16xf32>
    %558 = arith.mulf %95, %557 : vector<8x16xf32>
    %cst_207 = arith.constant dense<0.000000e+00> : vector<16xf32>
    %559 = vector.multi_reduction <add>, %558, %cst_207 [0] : vector<8x16xf32> to vector<16xf32>
    %560 = vector.shape_cast %559 : vector<16xf32> to vector<1x16xf32>
    %561 = tpu.concatenate %410, %460, %510, %560 in 0 : vector<1x16xf32>, vector<1x16xf32>, vector<1x16xf32>, vector<1x16xf32> -> vector<4x16xf32>
    %c0_208 = arith.constant 0 : index
    %c4_209 = arith.constant 4 : index
    %c0_210 = arith.constant 0 : index
    %562 = vector.load %arg16[%c0_208, %c4_209, %c0_210] : memref<1x8x16xf32, #tpu.memory_space<vmem>>, vector<1x4x16xf32>
    %563 = vector.shape_cast %562 : vector<1x4x16xf32> to vector<4x16xf32>
    %564 = vector.shape_cast %561 : vector<4x16xf32> to vector<1x4x16xf32>
    tpu.vector_store %arg16[%c0_208, %c4_209, %c0_210], %564 {strides = array<i32>} : memref<1x8x16xf32, #tpu.memory_space<vmem>>, vector<1x4x16xf32>,
    return
  }
  func.func @transform_0(%arg0: i32, %arg1: i32) -> (i32, i32) {
    %c0_i32 = arith.constant 0 : i32
    %c0_i32_0 = arith.constant 0 : i32
    %c0_i32_1 = arith.constant 0 : i32
    return %c0_i32, %c0_i32_0 : i32, i32
  }
  func.func @transform_1(%arg0: i32, %arg1: i32) -> i32 {
    %c0_i32 = arith.constant 0 : i32
    %c0_i32_0 = arith.constant 0 : i32
    return %c0_i32 : i32
  }
  func.func @transform_2(%arg0: i32, %arg1: i32) -> (i32, i32) {
    %c0_i32 = arith.constant 0 : i32
    %c0_i32_0 = arith.constant 0 : i32
    %c0_i32_1 = arith.constant 0 : i32
    return %c0_i32, %c0_i32_0 : i32, i32
  }
  func.func @transform_3(%arg0: i32, %arg1: i32) -> i32 {
    %c0_i32 = arith.constant 0 : i32
    %c0_i32_0 = arith.constant 0 : i32
    return %c0_i32 : i32
  }
  func.func @transform_4(%arg0: i32, %arg1: i32) -> (i32, i32, i32) {
    %c0_i32 = arith.constant 0 : i32
    %c0_i32_0 = arith.constant 0 : i32
    return %arg0, %c0_i32, %arg1 : i32, i32, i32
  }
  func.func @transform_5(%arg0: i32, %arg1: i32) -> (i32, i32, i32, i32) {
    %c0_i32 = arith.constant 0 : i32
    %c0_i32_0 = arith.constant 0 : i32
    %c0_i32_1 = arith.constant 0 : i32
    return %arg0, %c0_i32, %c0_i32_0, %arg1 : i32, i32, i32, i32
  }
  func.func @transform_6(%arg0: i32, %arg1: i32) -> (i32, i32, i32, i32) {
    %c0_i32 = arith.constant 0 : i32
    %c0_i32_0 = arith.constant 0 : i32
    %c0_i32_1 = arith.constant 0 : i32
    return %arg0, %c0_i32, %c0_i32_0, %arg1 : i32, i32, i32, i32
  }
  func.func @transform_7(%arg0: i32, %arg1: i32) -> (i32, i32, i32, i32) {
    %c0_i32 = arith.constant 0 : i32
    %c0_i32_0 = arith.constant 0 : i32
    %c0_i32_1 = arith.constant 0 : i32
    return %arg0, %c0_i32, %c0_i32_0, %arg1 : i32, i32, i32, i32
  }
  func.func @transform_8(%arg0: i32, %arg1: i32) -> (i32, i32, i32) {
    %c0_i32 = arith.constant 0 : i32
    %c0_i32_0 = arith.constant 0 : i32
    return %arg0, %c0_i32, %arg1 : i32, i32, i32
  }
  func.func @transform_9(%arg0: i32, %arg1: i32) -> (i32, i32, i32, i32) {
    %c0_i32 = arith.constant 0 : i32
    %c0_i32_0 = arith.constant 0 : i32
    %c0_i32_1 = arith.constant 0 : i32
    return %arg0, %c0_i32, %c0_i32_0, %arg1 : i32, i32, i32, i32
  }
  func.func @transform_10(%arg0: i32, %arg1: i32) -> (i32, i32, i32, i32) {
    %c0_i32 = arith.constant 0 : i32
    %c0_i32_0 = arith.constant 0 : i32
    %c0_i32_1 = arith.constant 0 : i32
    return %arg0, %c0_i32, %c0_i32_0, %arg1 : i32, i32, i32, i32
  }
  func.func @transform_11(%arg0: i32, %arg1: i32) -> (i32, i32, i32, i32) {
    %c0_i32 = arith.constant 0 : i32
    %c0_i32_0 = arith.constant 0 : i32
    %c0_i32_1 = arith.constant 0 : i32
    return %arg0, %c0_i32, %c0_i32_0, %arg1 : i32, i32, i32, i32
  }
  func.func @transform_12(%arg0: i32, %arg1: i32) -> (i32, i32, i32) {
    %c0_i32 = arith.constant 0 : i32
    %c0_i32_0 = arith.constant 0 : i32
    return %arg0, %c0_i32, %arg1 : i32, i32, i32
  }
  func.func @transform_13(%arg0: i32, %arg1: i32) -> (i32, i32, i32) {
    %c0_i32 = arith.constant 0 : i32
    %c0_i32_0 = arith.constant 0 : i32
    return %arg0, %c0_i32, %arg1 : i32, i32, i32
  }
  func.func @transform_14(%arg0: i32, %arg1: i32) -> (i32, i32, i32) {
    %c0_i32 = arith.constant 0 : i32
    %c0_i32_0 = arith.constant 0 : i32
    return %arg0, %c0_i32, %arg1 : i32, i32, i32
  }
  func.func @transform_15(%arg0: i32, %arg1: i32) -> (i32, i32, i32) {
    %c0_i32 = arith.constant 0 : i32
    %c0_i32_0 = arith.constant 0 : i32
    return %arg0, %c0_i32, %arg1 : i32, i32, i32
  }
}

</mosaic_0001>

<bundles_post_ra>
// kernel: gt_module_forward.1
= control target key start
LH: loop header
LB: loop body
LE: loop exit
PB: predicated region body
PF: predicated region fallthrough
CT: control target
= control target key end

     0   :  { %s3108_s0 = inlined_call_operand.vmem [shape: f32[4,8], index: 0, kind: input, shape index: {}]   ;;  %s3109_s1 = inlined_call_operand.vmem [shape: f32[4], index: 1, kind: input, shape index: {}]   ;;  %s3110_s2 = inlined_call_operand.vmem [shape: f32[4,10], index: 2, kind: input, shape index: {}]   ;;  %s3111_s3 = inlined_call_operand.vmem [shape: f32[4], index: 3, kind: input, shape index: {}]   ;;  %s3112_s4 = inlined_call_operand.vmem [shape: bf16[4,4,16], index: 4, kind: input, shape index: {}]   ;;  %s3113_s5 = inlined_call_operand.vmem [shape: bf16[4,4,8,16], index: 5, kind: input, shape index: {}]   ;;  %s3114_s6 = inlined_call_operand.vmem [shape: bf16[4,4,8,16], index: 6, kind: input, shape index: {}]   ;;  %s3115_s7 = inlined_call_operand.vmem [shape: bf16[4,8,8,16], index: 7, kind: input, shape index: {}]   ;;  %s3116_s8 = inlined_call_operand.vmem [shape: bf16[4,4,16], index: 8, kind: input, shape index: {}]   ;;  %s3117_s9 = inlined_call_operand.vmem [shape: bf16[4,4,8,16], index: 9, kind: input, shape index: {}]   ;;  %s3118_s10 = inlined_call_operand.vmem [shape: bf16[4,4,8,16], index: 10, kind: input, shape index: {}]   ;;  %s3119_s11 = inlined_call_operand.vmem [shape: bf16[4,3,8,16], index: 11, kind: input, shape index: {}]   ;;  %s3120_s12 = inlined_call_operand.vmem [shape: bf16[4,3,16], index: 12, kind: input, shape index: {}]   ;;  %s3121_s13 = inlined_call_operand.vmem [shape: f32[4,8,16], index: 13, kind: output, shape index: {0}]   ;;  %s3122_s14 = inlined_call_operand.vmem [shape: f32[4,8,16], index: 14, kind: output, shape index: {1}]   ;;  %s3123_s15 = inlined_call_operand.vmem [shape: f32[4,8,16], index: 15, kind: output, shape index: {2}]  }
   0x1   :  { %3133 = sst [smem:[#allocation17_spill]] %s3108_s0 }
   0x2   :  { %3134 = sst [smem:[#allocation18_spill]] %s3109_s1 }
   0x3   :  { %3135 = sst [smem:[#allocation19_spill]] %s3110_s2 }
   0x4   :  { %3136 = sst [smem:[#allocation20_spill]] %s3111_s3 }
   0x5   :  { %3137 = sst [smem:[#allocation21_spill]] %s3112_s4 }
   0x6   :  { %3138 = sst [smem:[#allocation22_spill]] %s3113_s5 }
   0x7   :  { %3139 = sst [smem:[#allocation23_spill]] %s3114_s6 }
   0x8   :  { %3140 = sst [smem:[#allocation24_spill]] %s3115_s7 }
   0x9   :  { %21 = vsyncpa [#allocation3], 0 }
   0xa   :  { %22 = vsyncpa [#allocation5], 0 }
   0xb   :  { %23 = vsyncpa [#allocation8], 0  ;;  %s2310_s18 = smov 0   ;;  %s2312_s19 = smov 0  }
   0xc   :  { %s2314_s20 = smov 0  }
   0xd LB: > { %s3141_s1 = sld [smem:[#allocation18_spill]]  ;;  %s1882_s24 = sadd.s32 4294967295, %s2224_s20   ;;  %s2224_s20 = sphi %s2314_s20, %s29_s20   ;;  %s2220_s19 = sphi %s2312_s19, %s3185_s19   ;;  %s2216_s18 = sphi %s2310_s18, %s3184_s18  }
   0xe   : > { %p1884_p0 = scmp.ge.s32.totalorder %s2224_s20, 1  ;;  %p466_p1 = scmp.lt.s32.totalorder %s2224_s20, 5 }
   0xf   : > { %p2331_p2 = scmp.eq.s32.totalorder %s1882_s24, 0  ;;  %s41_s27 = sadd.s32 1, %s2220_s19 }
  0x10   : > { %p2335_p3 = pnand %p1884_p0, %p466_p1  ;;  %s3144_s0 = sld [smem:[#allocation17_spill]] }
  0x11   : > { %s3142_s25 = scalar_select %p2331_p2, 1, 0 }
  0x12   : > { %s3143_s26 = scalar_select %p2335_p3, 1, 0 }
  0x13   : > { %s490_s23 = sshll.u32 %s3141_s1, 4  ;;  %p2071_p4 = pneg %p2335_p3  ;;  %s491_s23 = int_to_ptr.vmem [resolvable:$true] %s490_s23 }
  0x14   : > { %p2351_p6 = scmp.ge.s32.totalorder %s41_s27, 4  ;;  %s3147_s2 = sld [smem:[#allocation19_spill]] }
  0x15   : > { %p2347_p5 = pnand %p2331_p2, %p2071_p4  ;;  %s2130_s1 = scalar_lea.vmem %s491_s23, 16 }
  0x16   : > { %s479_s30 = sshll.u32 %s3144_s0, 4  ;;  %p2131_p7 = scmp.ne.s32.totalorder %s491_s23, %s2130_s1  ;;  %s480_s30 = int_to_ptr.vmem [resolvable:$true] %s479_s30 }
  0x17   : > { %p2132_p8 = pneg %p2347_p5  ;;  %p2138_p11 = scmp.lt.s32.totalorder %s491_s23, %s491_s23 }
  0x18   : > { %p2139_p12 = scmp.lt.s32.totalorder %s2130_s1, %s2130_s1 }
  0x19   : > { %p2133_p9 = pnand %p2132_p8, %p2131_p7 }
  0x1a   : > { %s501_s24 = sshll.u32 %s3147_s2, 4  ;;  %p2140_p13 = por %p2139_p12, %p2138_p11  ;;  %s502_s24 = int_to_ptr.vmem [resolvable:$true] %s501_s24 }
  0x1b   : > { %p2134_p10 = pneg %p2133_p9 }
  0x1d   : > { %p2141_p0 = pnand %p2140_p13, %p2134_p10 }
  0x1f   : > { %2144 = shalt.err (!%p2141_p0)
}
  0x20   : > { %s2226_s28 = smov [#allocation4]   ;;  %s3187_s27 = smov (%p2351_p6, %s41_s27), 0 }
  0x21   : > { %2077 = dma.vmem_to_smem (!%p2347_p5), %s491_s23, 16, %s2226_s28, [#allocation5]  }
  0x22   : > { %s2145_s29 = scalar_lea.vmem %s480_s30, 64  ;;  %p2153_p9 = scmp.lt.s32.totalorder %s480_s30, %s480_s30 }
  0x23   : > { %p2146_p1 = scmp.ne.s32.totalorder %s480_s30, %s2145_s29  ;;  %p2154_p2 = scmp.lt.s32.totalorder %s2145_s29, %s2145_s29 }
  0x25   : > { %p2148_p4 = pnand %p2146_p1, %p2132_p8  ;;  %p2155_p11 = por %p2154_p2, %p2153_p9 }
  0x27   : > { %p2149_p7 = pneg %p2148_p4 }
  0x29   : > { %p2156_p10 = pnand %p2155_p11, %p2149_p7 }
  0x2b   : > { %2159 = shalt.err (!%p2156_p10)
}
  0x2c   : > { %s2227_s1 = smov [#allocation2]   ;;  %s2160_s23 = scalar_lea.vmem %s502_s24, 64 }
  0x2d   : > { %2074 = dma.vmem_to_smem (!%p2347_p5), %s480_s30, 64, %s2227_s1, [#allocation3]  }
  0x2e   : > { %p2161_p6 = scmp.ne.s32.totalorder %s502_s24, %s2160_s23  ;;  %p2168_p0 = scmp.lt.s32.totalorder %s502_s24, %s502_s24 }
  0x2f   : > { %p2169_p1 = scmp.lt.s32.totalorder %s2160_s23, %s2160_s23 }
  0x30   : > { %p2163_p12 = pnand %p2161_p6, %p2132_p8 }
  0x31   : > { %p2170_p4 = por %p2169_p1, %p2168_p0 }
  0x32   : > { %p2164_p13 = pneg %p2163_p12 }
  0x34   : > { %p2171_p3 = pnand %p2170_p4, %p2164_p13 }
  0x36   : > { %2174 = shalt.err (!%p2171_p3)
}
  0x37   : > { %s2228_s17 = smov [#allocation6]   ;;  %s3148_s3 = sld [smem:[#allocation20_spill]] }
  0x38   : > { %2080 = dma.vmem_to_smem (!%p2347_p5), %s502_s24, 64, %s2228_s17, [#allocation5]  }
  0x3d   : > { %s512_s30 = sshll.u32 %s3148_s3, 4  ;;  %s513_s30 = int_to_ptr.vmem [resolvable:$true] %s512_s30 }
  0x3e   : > { %s2175_s28 = scalar_lea.vmem %s513_s30, 16  ;;  %p2183_p11 = scmp.lt.s32.totalorder %s513_s30, %s513_s30 }
  0x3f   : > { %p2176_p2 = scmp.ne.s32.totalorder %s513_s30, %s2175_s28  ;;  %p2184_p10 = scmp.lt.s32.totalorder %s2175_s28, %s2175_s28 }
  0x41   : > { %p2178_p7 = pnand %p2176_p2, %p2132_p8  ;;  %p2185_p6 = por %p2184_p10, %p2183_p11 }
  0x43   : > { %p2179_p9 = pneg %p2178_p7 }
  0x45   : > { %p2186_p3 = pnand %p2185_p6, %p2179_p9 }
  0x47   : > { %2189 = shalt.err (!%p2186_p3)
}
  0x48   : > { %s2229_s29 = smov [#allocation7]   ;;  %p3149_p12 = scmp.ne.s32.totalorder %s3143_s26, 0 }
  0x49   : > { %2083 = dma.vmem_to_smem (!%p2347_p5), %s513_s30, 16, %s2229_s29, [#allocation8]  }
  0x4a   : > { %621 = sbr.rel (%p3149_p12) target bundleno = 247 (0xf7), region = 72 }
  0x51   : > { %p3150_p13 = scmp.ne.s32.totalorder %s3142_s25, 0 }
  0x53   : > { %2203 = dma.done.wait (%p3150_p13), [#allocation3], 64  }
  0x54   : > { %2205 = vsyncadd (%p3150_p13), [#allocation3], 4294967232 }
  0x55   : > { %2207 = dma.done.wait (%p3150_p13), [#allocation5], 80  }
  0x56   : > { %2209 = vsyncadd (%p3150_p13), [#allocation5], 4294967216 }
  0x57   : > { %2211 = dma.done.wait (%p3150_p13), [#allocation8], 16  }
  0x58   : > { %2213 = vsyncadd (%p3150_p13), [#allocation8], 4294967280 }
  0x59   : > { %639 = sfence }
  0x5a   : > { %p762_p5 = scmp.lt.s32.totalorder %s2216_s18, 3  ;;  %v912_v0 = vlaneseq  ;;  %s2402_s26 = sld [smem:[#allocation2]]  ;;  %vm935_vm0 = vcmask 130048   ;;  %vm1034_vm3 = vcmask 1041409   ;;  %vm1036_vm4 = vcmask 1042434  }
  0x5b   : > { %s2409_s16 = sld [smem:[#allocation2 + $0x1]]  ;;  %s3151_s4 = sld [smem:[#allocation21_spill]]  ;;  %vm1038_vm5 = vcmask 1043459   ;;  %vm1041_vm6 = vcmask 125952   ;;  %vm1215_vm7 = vcmask 1040384   ;;  %vm1217_vm8 = vcmask 1041408  }
  0x5c   : > { %s3189_s18 = smov (!%p762_p5, %s2216_s18), 3  ;;  %v2407_v1 = vshrl.u32 %v912_v0, 7  ;;  %s3152_s5 = sld [smem:[#allocation22_spill]]  ;;  %vm1219_vm9 = vcmask 1042432  }
  0x5d   : > { %s2412_s24 = sshll.u32 %s3189_s18, 1  ;;  %s1990_s25 = sshll.u32 %s3189_s18, 4 }
  0x5e   : > { %v2423_v2 = vsub.s32 0, %v2407_v1  ;;  %v2426_v3 = vsub.s32 1, %v2407_v1  ;;  %s3153_s6 = sld [smem:[#allocation23_spill]]  ;;  %s1992_s2 = sshll.u32 %s3189_s18, 5  ;;  %v2437_v7 = vsub.s32 2, %v2407_v1  ;;  %v931_v12 = vsub.s32 3, %v2407_v1 }
  0x5f   : > { %s3154_s7 = sld [smem:[#allocation24_spill]]  ;;  %s815_s3 = scalar_lea.vmem %s3118_s10, %s1990_s25 }
  0x60   : > { %v1044_v13 = vstv %s2402_s26  ;;  %v2479_v33 = vld [vmem:[%s815_s3] sm:$0xff]   ;;  %v2481_v34 = vld [vmem:[%s815_s3 + $0x8] sm:$0xff]   ;;  %s2499_s22 = sld [smem:[#allocation2 + $0x4]]  ;;  %s2525_s28 = sld [smem:[#allocation4]] }
  0x61   : > { %s768_s17 = scalar_lea.vmem %s3151_s4, %s2412_s24  ;;  %s799_s4 = scalar_lea.vmem %s3116_s8, %s2412_s24 }
  0x62   : > { %s776_s30 = scalar_lea.vmem %s3152_s5, %s1990_s25  ;;  %v852_v4 = vld [vmem:[%s768_s17] sm:$0x3]  ;;  %s2505_s17 = sld [smem:[#allocation2 + $0x5]] }
  0x63   : > { %v2432_v5 = vld [vmem:[%s776_s30] sm:$0xff]   ;;  %v2434_v6 = vld [vmem:[%s776_s30 + $0x8] sm:$0xff]   ;;  %v2446_v8 = vunpack.c.l.bf16 %v852_v4  ;;  %s2507_s30 = sld [smem:[#allocation2 + $0x6]]  ;;  %s2527_s29 = sld [smem:[#allocation2 + $0x80]] }
  0x64   : > { %s784_s0 = scalar_lea.vmem %s3153_s6, %s1990_s25  ;;  %v1997_v9 = vunpack.c.l.bf16 %v2432_v5  ;;  %v1998_v14 = vunpack.c.h.bf16 %v2432_v5  ;;  %v2001_v15 = vunpack.c.l.bf16 %v2434_v6  ;;  %v2002_v16 = vunpack.c.h.bf16 %v2434_v6  ;;  %v886_v26 = vld [vmem:[%s799_s4] sm:$0x3]  ;;  %s2530_s3 = sld [smem:[#allocation2 + $0x81]] }
  0x65   : > { %s792_s21 = scalar_lea.vmem %s3154_s7, %s1992_s2  ;;  %v2449_v10 = vld [vmem:[%s784_s0] sm:$0xff]   ;;  %v2451_v11 = vld [vmem:[%s784_s0 + $0x8] sm:$0xff]   ;;  %s807_s2 = scalar_lea.vmem %s3117_s9, %s1990_s25  ;;  %v887_v38 = vunpack.c.l.bf16 %v886_v26  ;;  %v915_v50 = vrot.slane %v2446_v8, %v2423_v2  ;;  %v920_v51 = vrot.slane %v2446_v8, %v2426_v3  ;;  %v926_v52 = vrot.slane %v2446_v8, %v2437_v7 }
  0x66   : > { %v2005_v17 = vunpack.c.l.bf16 %v2449_v10  ;;  %v2012_v18 = vld [vmem:[%s792_s21] sm:$0xff]   ;;  %v2049_v19 = vld [vmem:[%s792_s21 + $0x8] sm:$0xff]   ;;  %v2050_v20 = vld [vmem:[%s792_s21 + $0x10] sm:$0xff]   ;;  %s2054_s0 = smul.u32 12, %s3189_s18  ;;  %v2006_v21 = vunpack.c.h.bf16 %v2449_v10  ;;  %v2009_v22 = vunpack.c.l.bf16 %v2451_v11  ;;  %v2010_v23 = vunpack.c.h.bf16 %v2451_v11  ;;  %s2483_s25 = sld [smem:[#allocation2 + $0x2]] }
  0x67   : > { %v2469_v24 = vunpack.c.l.bf16 %v2012_v18  ;;  %v2051_v25 = vld [vmem:[%s792_s21 + $0x18] sm:$0xff]   ;;  %v2028_v27 = vld [vmem:[%s807_s2] sm:$0xff]   ;;  %v2471_v28 = vunpack.c.h.bf16 %v2012_v18  ;;  %v2473_v29 = vunpack.c.l.bf16 %v2049_v19  ;;  %v2475_v30 = vunpack.c.h.bf16 %v2049_v19  ;;  %v2052_v32 = vld [vmem:[%s807_s2 + $0x8] sm:$0xff]   ;;  %s2496_s21 = sld [smem:[#allocation2 + $0x3]]  ;;  %s2522_s2 = sld [smem:[#allocation2 + $0x7]] }
  0x68   : > { %v2477_v31 = vunpack.c.l.bf16 %v2050_v20  ;;  %s2488_s4 = scalar_lea.vmem %s3119_s11, %s2054_s0  ;;  %v2490_v35 = vunpack.c.h.bf16 %v2050_v20  ;;  %v2492_v36 = vunpack.c.l.bf16 %v2051_v25  ;;  %v2494_v37 = vunpack.c.h.bf16 %v2051_v25  ;;  %s2535_s0 = sld [smem:[#allocation2 + $0x82]] }
  0x69   : > { %v2029_v39 = vunpack.c.l.bf16 %v2028_v27  ;;  %v2030_v40 = vunpack.c.h.bf16 %v2028_v27  ;;  %v2033_v41 = vunpack.c.l.bf16 %v2052_v32  ;;  %v2034_v42 = vunpack.c.h.bf16 %v2052_v32  ;;  %v2044_v43 = vld [vmem:[%s2488_s4] sm:$0xff]   ;;  %v906_v60 = vld [vmem:[%s2488_s4 + $0x8] sm:$0xf]  ;;  %s2540_s1 = sld [smem:[#allocation2 + $0x83]]  ;;  %s2542_s23 = sld [smem:[#allocation2 + $0x84]] }
  0x6a   : > { %v2509_v48 = vunpack.c.l.bf16 %v2044_v43  ;;  %v2511_v49 = vunpack.c.h.bf16 %v2044_v43  ;;  %v932_v53 = vrot.slane %v2446_v8, %v931_v12  ;;  %v959_v54 = vrot.slane %v887_v38, %v2423_v2  ;;  %s2551_s26 = sld [smem:[#allocation2 + $0x85]]  ;;  %s2570_s4 = sld [smem:[#allocation2 + $0x100]] }
  0x6b   : > { %v964_v55 = vrot.slane %v887_v38, %v2426_v3  ;;  %v916_v56 = vmul.f32 %v1997_v9, %v915_v50  ;;  %v921_v57 = vmul.f32 %v1998_v14, %v920_v51  ;;  %v970_v58 = vrot.slane %v887_v38, %v2437_v7  ;;  %s2805_s5 = sld [smem:[#allocation6 + $0x102]]  ;;  %s2812_s6 = sld [smem:[#allocation6 + $0x103]] }
  0x6c   : > { %3155 = vst [vmem:[#allocation12_spill] sm:$0xff] %v2509_v48  ;;  %v976_v59 = vrot.slane %v887_v38, %v931_v12  ;;  %v927_v61 = vmul.f32 %v2001_v15, %v926_v52  ;;  %v933_v62 = vmul.f32 %v2002_v16, %v932_v53  ;;  %v960_v63 = vmul.f32 %v2029_v39, %v959_v54  ;;  %s2819_s7 = sld [smem:[#allocation6 + $0x105]] }
  0x6d   : > { %v965_v0 = vmul.f32 %v2030_v40, %v964_v55  ;;  %v922_v1 = vadd.f32 %v921_v57, %v916_v56  ;;  %v971_v4 = vmul.f32 %v2033_v41, %v970_v58  ;;  %v1045_v6 = vmul.f32 %v2469_v24, %v1044_v13 }
  0x6e   : > { %v977_v5 = vmul.f32 %v2034_v42, %v976_v59  ;;  %v1047_v9 = vstv %s2409_s16  ;;  %v1051_v12 = vstv %s2483_s25  ;;  %v1055_v14 = vstv %s2496_s21  ;;  %s2553_s16 = sld [smem:[#allocation2 + $0x86]]  ;;  %s2564_s25 = sld [smem:[#allocation2 + $0x87]] }
  0x6f   : > { %v966_v8 = vadd.f32 %v965_v0, %v960_v63  ;;  %v2544_v15 = vunpack.c.l.bf16 %v906_v60  ;;  %v928_v16 = vadd.f32 %v927_v61, %v922_v1  ;;  %v1048_v18 = vmul.f32 %v2471_v28, %v1047_v9  ;;  %s2576_s21 = sld [smem:[#allocation2 + $0x101]] }
  0x70   : > { %v1052_v19 = vmul.f32 %v2473_v29, %v1051_v12  ;;  %v1059_v13 = vstv %s2499_s22  ;;  %v1063_v25 = vstv %s2505_s17  ;;  %v1067_v26 = vstv %s2507_s30  ;;  %s2578_s22 = sld [smem:[#allocation2 + $0x102]]  ;;  %s2585_s17 = sld [smem:[#allocation2 + $0x103]] }
  0x71   : > { %v972_v20 = vadd.f32 %v971_v4, %v966_v8  ;;  %v2555_v27 = vadd.f32 %v933_v62, %v928_v16  ;;  %v1049_v32 = vadd.f32 %v1048_v18, %v1045_v6  ;;  %v1056_v38 = vmul.f32 %v2475_v30, %v1055_v14  ;;  %s2591_s30 = sld [smem:[#allocation2 + $0x104]] }
  0x72   : > { %v1060_v39 = vmul.f32 %v2477_v31, %v1059_v13  ;;  %v1064_v41 = vmul.f32 %v2490_v35, %v1063_v25  ;;  %v1068_v42 = vmul.f32 %v2492_v36, %v1067_v26  ;;  %v1071_v43 = vstv %s2522_s2  ;;  %s2593_s2 = sld [smem:[#allocation2 + $0x105]] }
  0x73   : > { %v2559_v40 = vadd.f32 %v977_v5, %v972_v20  ;;  %v936_v50 = vsel %vm935_vm0, %v2555_v27, -inf  ;;  %v1053_v51 = vadd.f32 %v1052_v19, %v1049_v32  ;;  %v1075_v52 = vstv %s2525_s28  ;;  %s2596_s28 = sld [smem:[#allocation4 + $0x1]] }
  0x74   : > { %v1087_v53 = vstv %s2527_s29  ;;  %v937_v54 = vrot.slane %v936_v50, 4  ;;  %v1090_v57 = vstv %s2530_s3  ;;  %v1094_v61 = vstv %s2535_s0  ;;  %s2601_s29 = sld [smem:[#allocation2 + $0x106]]  ;;  %s2643_s3 = sld [smem:[#allocation2 + $0x187]] }
  0x75   : > { %v979_v55 = vsel %vm935_vm0, %v2559_v40, -inf  ;;  %v1088_v56 = vmul.f32 %v2469_v24, %v1087_v53  ;;  %v1057_v59 = vadd.f32 %v1056_v38, %v1053_v51  ;;  %v1091_v60 = vmul.f32 %v2471_v28, %v1090_v57  ;;  %s2672_s0 = sld [smem:[#allocation6 + $0x2]] }
  0x76   : > { %v980_v58 = vrot.slane %v979_v55, 4  ;;  %v938_v62 = vmax.f32 %v936_v50, %v937_v54  ;;  %v1095_v63 = vmul.f32 %v2473_v29, %v1094_v61  ;;  %v1098_v0 = vstv %s2540_s1  ;;  %s830_s1 = scalar_lea.vmem %s3120_s12, %s2412_s24  ;;  %s2616_s24 = sld [smem:[#allocation2 + $0x181]] }
  0x77   : > { %v1102_v1 = vstv %s2542_s23  ;;  %v1061_v5 = vadd.f32 %v1060_v39, %v1057_v59  ;;  %v1092_v6 = vadd.f32 %v1091_v60, %v1088_v56  ;;  %v1099_v8 = vmul.f32 %v2475_v30, %v1098_v0  ;;  %s2611_s23 = sld [smem:[#allocation2 + $0x107]] }
  0x78   : > { %v981_v4 = vmax.f32 %v979_v55, %v980_v58  ;;  %v939_v9 = vrot.slane %v938_v62, 2  ;;  %v1072_v12 = vmul.f32 %v2494_v37, %v1071_v43  ;;  %v1106_v14 = vstv %s2551_s26  ;;  %s2614_s26 = sld [smem:[#allocation2 + $0x180]] }
  0x79   : > { %v1110_v16 = vstv %s2553_s16  ;;  %v1065_v19 = vadd.f32 %v1064_v41, %v1061_v5  ;;  %v1096_v20 = vadd.f32 %v1095_v63, %v1092_v6  ;;  %v1103_v13 = vmul.f32 %v2477_v31, %v1102_v1  ;;  %s2621_s16 = sld [smem:[#allocation2 + $0x182]] }
  0x7a   : > { %v982_v18 = vrot.slane %v981_v4, 2  ;;  %v940_v25 = vmax.f32 %v938_v62, %v939_v9  ;;  %v1107_v26 = vmul.f32 %v2490_v35, %v1106_v14  ;;  %v1111_v32 = vmul.f32 %v2492_v36, %v1110_v16 }
  0x7b   : > { %v1114_v38 = vstv %s2564_s25  ;;  %v1069_v41 = vadd.f32 %v1068_v42, %v1065_v19  ;;  %v1100_v43 = vadd.f32 %v1099_v8, %v1096_v20  ;;  %v1130_v53 = vstv %s2570_s4  ;;  %v910_v42 = vld [vmem:[%s830_s1] sm:$0x3]  ;;  %s2626_s25 = sld [smem:[#allocation2 + $0x183]]  ;;  %s2628_s4 = sld [smem:[#allocation2 + $0x184]] }
  0x7c   : > { %v983_v39 = vmax.f32 %v981_v4, %v982_v18  ;;  %v1115_v50 = vmul.f32 %v2494_v37, %v1114_v38  ;;  %v941_v51 = vrot.slane %v940_v25, 1  ;;  %v1133_v54 = vstv %s2576_s21  ;;  %s2633_s21 = sld [smem:[#allocation4 + $0x2]]  ;;  %s2678_s1 = sld [smem:[#allocation6 + $0x3]] }
  0x7d   : > { %v1137_v55 = vstv %s2578_s22  ;;  %v1073_v57 = vadd.f32 %v1072_v12, %v1069_v41  ;;  %v1104_v58 = vadd.f32 %v1103_v13, %v1100_v43  ;;  %v1131_v59 = vmul.f32 %v2469_v24, %v1130_v53  ;;  %s2635_s22 = sld [smem:[#allocation2 + $0x185]] }
  0x7e   : > { %v984_v56 = vrot.slane %v983_v39, 1  ;;  %v942_v60 = vmax.f32 %v940_v25, %v941_v51  ;;  %v1134_v61 = vmul.f32 %v2471_v28, %v1133_v54  ;;  %v1138_v62 = vmul.f32 %v2473_v29, %v1137_v55 }
  0x7f   : > { %v1141_v63 = vstv %s2585_s17  ;;  %v2623_v1 = vadd.f32 %v1075_v52, %v1073_v57  ;;  %v1108_v4 = vadd.f32 %v1107_v26, %v1104_v58  ;;  %v1145_v9 = vstv %s2591_s30  ;;  %s2641_s17 = sld [smem:[#allocation2 + $0x186]]  ;;  %s2647_s30 = sld [smem:[#allocation4 + $0x3]] }
  0x80   : > { %v985_v0 = vmax.f32 %v983_v39, %v984_v56  ;;  %v1142_v5 = vmul.f32 %v2475_v30, %v1141_v63  ;;  %v943_v6 = vsub.f32 %v2555_v27, %v942_v60  ;;  %v1135_v8 = vadd.f32 %v1134_v61, %v1131_v59 }
  0x81   : > { %v1149_v12 = vstv %s2593_s2  ;;  %v2637_v14 = vunpack.c.l.bf16 %v910_v42  ;;  %v1112_v16 = vadd.f32 %v1111_v32, %v1108_v4  ;;  %v1118_v18 = vstv %s2596_s28  ;;  %s2657_s2 = sld [smem:[#allocation6]]  ;;  %s2662_s28 = sld [smem:[#allocation6 + $0x1]] }
  0x82   : > { %v986_v52 = vsub.f32 %v2559_v40, %v985_v0  ;;  %v944_v27 = vmul.f32 1.442695, %v943_v6  ;;  %v1139_v19 = vadd.f32 %v1138_v62, %v1135_v8  ;;  %v1146_v20 = vmul.f32 %v2477_v31, %v1145_v9 }
  0x83   : > { %3156 = vst [vmem:[#allocation13_spill] sm:$0xff] %v2637_v14  ;;  %v1153_v13 = vstv %s2601_s29  ;;  %v1116_v26 = vadd.f32 %v1115_v50, %v1112_v16  ;;  %v1150_v32 = vmul.f32 %v2490_v35, %v1149_v12  ;;  %v1157_v41 = vstv %s2611_s23  ;;  %s2664_s29 = sld [smem:[#allocation6 + $0x4]]  ;;  %s2689_s23 = sld [smem:[#allocation6 + $0x5]] }
  0x84   : > { %v987_v25 = vmul.f32 1.442695, %v986_v52  ;;  %2120 = vpow2.f32 %v944_v27  ;;  %v1143_v38 = vadd.f32 %v1142_v5, %v1139_v19  ;;  %v1154_v39 = vmul.f32 %v2492_v36, %v1153_v13 }
  0x85   : > { %v2653_v43 = vadd.f32 %v1118_v18, %v1116_v26  ;;  %v1173_v51 = vstv %s2614_s26  ;;  %v1176_v53 = vstv %s2616_s24  ;;  %v1180_v56 = vstv %s2621_s16  ;;  %s2693_s26 = sld [smem:[#allocation6 + $0x6]]  ;;  %s2721_s24 = sld [smem:[#allocation6 + $0x7]] }
  0x86   : > { %2122 = vpow2.f32 %v987_v25  ;;  %v1147_v54 = vadd.f32 %v1146_v20, %v1143_v38  ;;  %v1174_v50 = vmul.f32 %v2469_v24, %v1173_v51  ;;  %v1177_v55 = vmul.f32 %v2471_v28, %v1176_v53  ;;  %s2723_s16 = sld [smem:[#allocation6 + $0x8]] }
  0x87   : > { %v1158_v57 = vmul.f32 %v2494_v37, %v1157_v41  ;;  %v1181_v58 = vmul.f32 %v2473_v29, %v1180_v56  ;;  %v1184_v59 = vstv %s2626_s25  ;;  %v1188_v42 = vstv %s2628_s4  ;;  %s2730_s25 = sld [smem:[#allocation6 + $0x9]]  ;;  %s2732_s4 = sld [smem:[#allocation7]] }
  0x88   : > { %v1151_v60 = vadd.f32 %v1150_v32, %v1147_v54  ;;  %v1161_v61 = vstv %s2633_s21  ;;  %v1178_v62 = vadd.f32 %v1177_v55, %v1174_v50  ;;  %v1185_v24 = vmul.f32 %v2475_v30, %v1184_v59  ;;  %s2740_s21 = sld [smem:[#allocation6 + $0x80]] }
  0x89   : > { %v1192_v63 = vstv %s2635_s22  ;;  %v1196_v0 = vstv %s2641_s17  ;;  %v1200_v4 = vstv %s2643_s3  ;;  %v1189_v29 = vmul.f32 %v2477_v31, %v1188_v42  ;;  %s2742_s22 = sld [smem:[#allocation6 + $0x81]]  ;;  %s2750_s17 = sld [smem:[#allocation6 + $0x82]] }
  0x8a   : > { %v1155_v5 = vadd.f32 %v1154_v39, %v1151_v60  ;;  %v1182_v6 = vadd.f32 %v1181_v58, %v1178_v62  ;;  %v1204_v8 = vstv %s2647_s30  ;;  %v1193_v9 = vmul.f32 %v2490_v35, %v1192_v63  ;;  %s2752_s3 = sld [smem:[#allocation6 + $0x83]]  ;;  %s2758_s30 = sld [smem:[#allocation6 + $0x84]] }
  0x8b   : > { %v1266_v30 = vrot.slane %v2637_v14, %v2423_v2  ;;  %v1271_v12 = vrot.slane %v2637_v14, %v2426_v3  ;;  %v1276_v52 = vrot.slane %v2637_v14, %v2437_v7  ;;  %v1197_v31 = vmul.f32 %v2492_v36, %v1196_v0 }
  0x8c   : > { %v1159_v16 = vadd.f32 %v1158_v57, %v1155_v5  ;;  %v1186_v18 = vadd.f32 %v1185_v24, %v1182_v6  ;;  %v1201_v27 = vmul.f32 %v2494_v37, %v1200_v4  ;;  %v1291_v13 = vstv %s2657_s2 }
  0x8d   : > { %v2696_v35 = vsub.f32 %v1266_v30, %v2509_v48  ;;  %v2699_v19 = vsub.f32 %v1271_v12, %v2511_v49  ;;  %v2702_v20 = vsub.f32 %v1276_v52, %v2544_v15  ;;  %v1294_v32 = vstv %s2662_s28  ;;  %s2766_s28 = sld [smem:[#allocation6 + $0x85]] }
  0x8e   : > { %v2705_v25 = vpop.eup %2120  ;;  %v2707_v26 = vadd.f32 %v1161_v61, %v1159_v16  ;;  %v1190_v36 = vadd.f32 %v1189_v29, %v1186_v18  ;;  %v1306_v37 = vstv %s2664_s29  ;;  %v1298_v56 = vstv %s2672_s0  ;;  %s2768_s29 = sld [smem:[#allocation6 + $0x86]]  ;;  %s2775_s0 = sld [smem:[#allocation6 + $0x87]] }
  0x8f   : > { %3157 = vst [vmem:[#allocation14_spill] sm:$0xff] %v2696_v35  ;;  %3158 = vst [vmem:[#allocation15_spill] sm:$0xff] %v2699_v19  ;;  %v946_v39 = vsel %vm935_vm0, %v2705_v25, 0.0  ;;  %v1278_v41 = vmul.f32 %v2696_v35, %v2696_v35  ;;  %v1279_v51 = vmul.f32 %v2699_v19, %v2699_v19  ;;  %v1281_v53 = vmul.f32 %v2702_v20, %v2702_v20 }
  0x90   : > { %3159 = vst [vmem:[#allocation16_spill] sm:$0xff] %v2702_v20  ;;  %v2711_v38 = vpop.eup %2122  ;;  %v947_v54 = vrot.slane %v946_v39, 4  ;;  %v1194_v55 = vadd.f32 %v1193_v9, %v1190_v36  ;;  %v1302_v42 = vstv %s2678_s1  ;;  %v2735_v62 = vmul.f32 %v1294_v32, %v2696_v35  ;;  %s2777_s1 = sld [smem:[#allocation6 + $0x88]] }
  0x91   : > { %v989_v50 = vsel %vm935_vm0, %v2711_v38, 0.0  ;;  %v1280_v59 = vadd.f32 %v1279_v51, %v1278_v41  ;;  %v2738_v24 = vmul.f32 %v1306_v37, %v2637_v14  ;;  %v2747_v4 = vmul.f32 %v1298_v56, %v2699_v19 }
  0x92   : > { %v990_v57 = vrot.slane %v989_v50, 4  ;;  %v948_v60 = vadd.f32 %v947_v54, %v946_v39  ;;  %v1198_v61 = vadd.f32 %v1197_v31, %v1194_v55  ;;  %v1314_v5 = vstv %s2689_s23  ;;  %s2785_s23 = sld [smem:[#allocation6 + $0x89]] }
  0x93   : > { %v2744_v0 = vadd.f32 %v1281_v53, %v1280_v59  ;;  %v2755_v9 = vmul.f32 %v1314_v5, %v2637_v14  ;;  %v1322_v30 = vstv %s2693_s26  ;;  %v2762_v52 = vmul.f32 %v1302_v42, %v2702_v20  ;;  %s2795_s26 = sld [smem:[#allocation7 + $0x1]] }
  0x94   : > { %v991_v63 = vadd.f32 %v990_v57, %v989_v50  ;;  %v949_v6 = vrot.slane %v948_v60, 2  ;;  %v1202_v29 = vadd.f32 %v1201_v27, %v1198_v61  ;;  %v2781_v37 = vmul.f32 %v1322_v30, %v2637_v14 }
  0x95   : > { %2124 = vrsqrt.f32 %v2744_v0  ;;  %v1288_v27 = vand.u32 2147483648, %v2744_v0  ;;  %vm1285_vm1 = vcmp.eq.f32.partialorder %v2744_v0, inf  ;;  %v1330_v39 = vstv %s2721_s24  ;;  %s2797_s24 = sld [smem:[#allocation6 + $0x100]] }
  0x96   : > { %v992_v12 = vrot.slane %v991_v63, 2  ;;  %v950_v18 = vadd.f32 %v949_v6, %v948_v60  ;;  %v2770_v31 = vadd.f32 %v1204_v8, %v1202_v29  ;;  %v1334_v8 = vstv %s2723_s16  ;;  %s2803_s16 = sld [smem:[#allocation6 + $0x101]] }
  0x97   : > { %vm1287_vm2 = vcmp.eq.f32.partialorder %v2744_v0, 0.0  ;;  %v2790_v53 = vmul.f32 %v2509_v48, %v1330_v39  ;;  %v2793_v54 = vmul.f32 %v2511_v49, %v1334_v8  ;;  %v1338_v56 = vstv %s2730_s25  ;;  %s2817_s25 = sld [smem:[#allocation6 + $0x104]] }
  0x98   : > { %v993_v32 = vadd.f32 %v992_v12, %v991_v63  ;;  %v951_v41 = vrot.slane %v950_v18, 1  ;;  %v2808_v42 = vmul.f32 %v1338_v56, %v2544_v15  ;;  %v1354_v60 = vstv %s2740_s21  ;;  %s2826_s21 = sld [smem:[#allocation6 + $0x106]] }
  0x99   : > { %v1357_v61 = vstv %s2742_s22  ;;  %v1361_v6 = vstv %s2750_s17  ;;  %v1365_v29 = vstv %s2752_s3  ;;  %v1377_v39 = vstv %s2766_s28  ;;  %s2833_s22 = sld [smem:[#allocation6 + $0x107]]  ;;  %s2835_s17 = sld [smem:[#allocation6 + $0x108]] }
  0x9a   : > { %v994_v50 = vrot.slane %v993_v32, 1  ;;  %v952_v59 = vadd.f32 %v951_v41, %v950_v18  ;;  %v1358_v5 = vmul.f32 %v1357_v61, %v2696_v35  ;;  %v1362_v30 = vmul.f32 %v1361_v6, %v2699_v19  ;;  %s2873_s3 = sshll.u32 %s3189_s18, 3  ;;  %s2975_s28 = sld [smem:[#allocation6 + $0x109]] }
  0x9b   : > { %v2823_v12 = vmul.f32 %v1365_v29, %v2702_v20  ;;  %v1369_v18 = vstv %s2758_s30  ;;  %v1385_v8 = vstv %s2768_s29  ;;  %v2838_v41 = vmul.f32 %v1377_v39, %v2637_v14  ;;  %s837_s30 = scalar_lea.vmem %s3121_s13, %s2873_s3  ;;  %s2992_s29 = sld [smem:[#allocation7 + $0x2]] }
  0x9c   : > { %v995_v63 = vadd.f32 %v994_v50, %v993_v32  ;;  %2126 = vrcp.f32 %v952_v59  ;;  %v2829_v32 = vmul.f32 %v1369_v18, %v2637_v14  ;;  %v2841_v50 = vmul.f32 %v1385_v8, %v2637_v14 }
  0x9d   : > { %v1393_v56 = vstv %s2775_s0  ;;  %v1397_v59 = vstv %s2777_s1  ;;  %v1401_v18 = vstv %s2785_s23  ;;  %v1417_v36 = vstv %s2797_s24  ;;  %s2994_s0 = sld [smem:[#allocation6 + $0x180]]  ;;  %s3008_s1 = sld [smem:[#allocation6 + $0x181]] }
  0x9e   : > { %2128 = vrcp.f32 %v995_v63  ;;  %v2848_v6 = vmul.f32 %v2509_v48, %v1393_v56  ;;  %v2851_v29 = vmul.f32 %v2511_v49, %v1397_v59  ;;  %v2860_v55 = vmul.f32 %v1401_v18, %v2544_v15  ;;  %s3010_s23 = sld [smem:[#allocation6 + $0x182]]  ;;  %s3022_s24 = sld [smem:[#allocation6 + $0x183]] }
  0x9f   : > { %v2125_v61 = vpop.eup %2124  ;;  %v1420_v63 = vstv %s2803_s16  ;;  %v1424_v59 = vstv %s2805_s5  ;;  %v1428_v47 = vstv %s2812_s6  ;;  %v1432_v57 = vstv %s2817_s25  ;;  %s3024_s16 = sld [smem:[#allocation6 + $0x184]]  ;;  %s3031_s25 = sld [smem:[#allocation6 + $0x185]] }
  0xa0   : > { %v1284_v39 = vmul.f32 %v2125_v61, %v2744_v0  ;;  %v1421_v8 = vmul.f32 %v1420_v63, %v2696_v35  ;;  %v1425_v16 = vmul.f32 %v1424_v59, %v2699_v19  ;;  %v2882_v56 = vmul.f32 %v1428_v47, %v2702_v20  ;;  %s3044_s5 = scalar_lea.vmem %s3122_s14, %s2873_s3  ;;  %s3053_s6 = sld [smem:[#allocation6 + $0x187]] }
  0xa1   : > { %v2892_v45 = vmul.f32 %v1432_v57, %v2637_v14 }
  0xa2   : > { %v1286_v61 = vsel %vm1285_vm1, %v2744_v0, %v1284_v39  ;;  %v1440_v39 = vstv %s2819_s7  ;;  %s851_s7 = scalar_lea.vmem %s3123_s15, %s2873_s3  ;;  %s3065_s3 = sld [smem:[#allocation6 + $0x188]] }
  0xa3   : > { %v2879_v18 = vsel %vm1287_vm2, %v1288_v27, %v1286_v61  ;;  %v2895_v0 = vmul.f32 %v1440_v39, %v2637_v14  ;;  %v1448_v27 = vstv %s2826_s21  ;;  %v1456_v61 = vstv %s2833_s22  ;;  %s3033_s21 = sld [smem:[#allocation6 + $0x186]] }
  0xa4   : > { %v1292_v63 = vmul.f32 %v1291_v13, %v2879_v18  ;;  %v1355_v59 = vmul.f32 %v1354_v60, %v2879_v18  ;;  %v1418_v46 = vmul.f32 %v1417_v36, %v2879_v18  ;;  %v2911_v44 = vmul.f32 %v1448_v27, %v2637_v14 }
  0xa5   : > { %v2914_v28 = vmul.f32 %v2509_v48, %v1456_v61 }
  0xa6   : > { %v2127_v47 = vpop.eup %2126  ;;  %v1296_v13 = vadd.f32 %v2735_v62, %v1292_v63  ;;  %v1359_v51 = vadd.f32 %v1358_v5, %v1355_v59  ;;  %v1422_v60 = vadd.f32 %v1421_v8, %v1418_v46  ;;  %v3162_v59 = vmax.f32 %v2707_v26, 0.0 }
  0xa7   : > { %v954_v58 = vmul.f32 %v2127_v47, %v2705_v25 }
  0xa8   : > { %v2129_v57 = vpop.eup %2128  ;;  %v2920_v46 = vadd.f32 %v2747_v4, %v1296_v13  ;;  %v2922_v62 = vadd.f32 %v1362_v30, %v1359_v51  ;;  %v2924_v5 = vadd.f32 %v1425_v16, %v1422_v60  ;;  %v3160_v4 = vmax.f32 %v2623_v1, 0.0 }
  0xa9   : > { %v2917_v40 = vmul.f32 %v2129_v57, %v2711_v38  ;;  %955 = vst.msk [vmem:[%s851_s7] sm:$0xff] %vm935_vm0, %v954_v58  ;;  %v998_v25 = vmul.f32 %v2005_v17, %v954_v58  ;;  %v999_v8 = vmul.f32 %v2006_v21, %v954_v58  ;;  %v1000_v63 = vmul.f32 %v2009_v22, %v954_v58 }
  0xaa   : > { %v1001_v38 = vmul.f32 %v2010_v23, %v954_v58  ;;  %v1078_v51 = vmul.f32 %v3160_v4, %v954_v58  ;;  %v3161_v16 = vmax.f32 %v2653_v43, 0.0  ;;  %v1164_v27 = vmul.f32 %v3162_v59, %v954_v58 }
  0xab   : > { %v3163_v17 = vmax.f32 %v2770_v31, 0.0  ;;  %v1002_v10 = vsel %vm935_vm0, %v998_v25, 0.0  ;;  %v1009_v21 = vsel %vm935_vm0, %v999_v8, 0.0  ;;  %v1016_v22 = vsel %vm935_vm0, %v1000_v63, 0.0 }
  0xac   : > { %v1121_v30 = vmul.f32 %v3161_v16, %v954_v58  ;;  %v1023_v11 = vsel %vm935_vm0, %v1001_v38, 0.0  ;;  %v1003_v23 = vrot.slane %v1002_v10, 4  ;;  %v1010_v1 = vrot.slane %v1009_v21, 4 }
  0xad   : > { %v1207_v61 = vmul.f32 %v3163_v17, %v954_v58  ;;  %v1017_v47 = vrot.slane %v1016_v22, 4  ;;  %v1024_v13 = vrot.slane %v1023_v11, 4  ;;  %v1079_v43 = vsel %vm935_vm0, %v1078_v51, 0.0 }
  0xae   : > { %v1122_v26 = vsel %vm935_vm0, %v1121_v30, 0.0  ;;  %v1165_v31 = vsel %vm935_vm0, %v1164_v27, 0.0  ;;  %v1004_v60 = vadd.f32 %v1003_v23, %v1002_v10  ;;  %v1011_v57 = vadd.f32 %v1010_v1, %v1009_v21 }
  0xaf   : > { %v1208_v58 = vsel %vm935_vm0, %v1207_v61, 0.0  ;;  %v1018_v25 = vadd.f32 %v1017_v47, %v1016_v22  ;;  %v1025_v8 = vadd.f32 %v1024_v13, %v1023_v11  ;;  %v1080_v63 = vrot.slane %v1079_v43, 4 }
  0xb0   : > { %v1123_v38 = vrot.slane %v1122_v26, 4  ;;  %v1166_v4 = vrot.slane %v1165_v31, 4  ;;  %v1209_v16 = vrot.slane %v1208_v58, 4  ;;  %v1005_v59 = vrot.slane %v1004_v60, 2 }
  0xb1   : > { %v1012_v17 = vrot.slane %v1011_v57, 2  ;;  %v1019_v39 = vrot.slane %v1018_v25, 2  ;;  %v1026_v51 = vrot.slane %v1025_v8, 2  ;;  %v1081_v30 = vadd.f32 %v1080_v63, %v1079_v43 }
  0xb2   : > { %v1124_v27 = vadd.f32 %v1123_v38, %v1122_v26  ;;  %v1167_v36 = vadd.f32 %v1166_v4, %v1165_v31  ;;  %v1210_v61 = vadd.f32 %v1209_v16, %v1208_v58  ;;  %v1006_v10 = vadd.f32 %v1005_v59, %v1004_v60 }
  0xb3   : > { %v1013_v21 = vadd.f32 %v1012_v17, %v1011_v57  ;;  %v1020_v22 = vadd.f32 %v1019_v39, %v1018_v25  ;;  %v1027_v11 = vadd.f32 %v1026_v51, %v1025_v8  ;;  %v1082_v23 = vrot.slane %v1081_v30, 2 }
  0xb4   : > { %v1125_v1 = vrot.slane %v1124_v27, 2  ;;  %v1168_v47 = vrot.slane %v1167_v36, 2  ;;  %v1211_v13 = vrot.slane %v1210_v61, 2  ;;  %v1007_v48 = vrot.slane %v1006_v10, 1 }
  0xb5   : > { %v1014_v14 = vrot.slane %v1013_v21, 1  ;;  %v1021_v20 = vrot.slane %v1020_v22, 1  ;;  %v1028_v19 = vrot.slane %v1027_v11, 1  ;;  %v1083_v35 = vadd.f32 %v1082_v23, %v1081_v30 }
  0xb6   : > { %v1126_v43 = vadd.f32 %v1125_v1, %v1124_v27  ;;  %v1169_v26 = vadd.f32 %v1168_v47, %v1167_v36  ;;  %v1212_v31 = vadd.f32 %v1211_v13, %v1210_v61  ;;  %v1008_v58 = vadd.f32 %v1007_v48, %v1006_v10 }
  0xb7   : > { %v1015_v63 = vadd.f32 %v1014_v14, %v1013_v21  ;;  %v1022_v60 = vadd.f32 %v1021_v20, %v1020_v22  ;;  %v1029_v57 = vadd.f32 %v1028_v19, %v1027_v11  ;;  %v1084_v39 = vrot.slane %v1083_v35, 1 }
  0xb8   : > { %v1127_v25 = vrot.slane %v1126_v43, 1  ;;  %v1170_v8 = vrot.slane %v1169_v26, 1  ;;  %v1213_v38 = vrot.slane %v1212_v31, 1  ;;  %v3164_v16 = vunpack.c.l.bf16 %v2479_v33 }
  0xb9   : > { %v1035_v4 = vsel %vm1034_vm3, %v1015_v63, %v1008_v58  ;;  %v3165_v48 = vunpack.c.h.bf16 %v2479_v33  ;;  %v3166_v19 = vunpack.c.l.bf16 %v2481_v34  ;;  %v1085_v17 = vadd.f32 %v1084_v39, %v1083_v35 }
  0xba   : > { %v1222_v59 = vmul.f32 %v3164_v16, %v2917_v40  ;;  %v1037_v36 = vsel %vm1036_vm4, %v1022_v60, %v1035_v4  ;;  %v1128_v51 = vadd.f32 %v1127_v25, %v1126_v43  ;;  %v1171_v30 = vadd.f32 %v1170_v8, %v1169_v26 }
  0xbb   : > { %v1223_v14 = vmul.f32 %v3165_v48, %v2917_v40  ;;  %v1224_v20 = vmul.f32 %v3166_v19, %v2917_v40  ;;  %v1039_v27 = vsel %vm1038_vm5, %v1029_v57, %v1037_v36  ;;  %v1214_v61 = vadd.f32 %v1213_v38, %v1212_v31 }
  0xbc   : > { %v3167_v10 = vunpack.c.h.bf16 %v2481_v34  ;;  %v1226_v22 = vsel %vm935_vm0, %v1222_v59, 0.0  ;;  %1042 = vst.msk [vmem:[%s837_s30] sm:$0xf] %vm1041_vm6, %v1039_v27  ;;  %v1216_v33 = vsel %vm1215_vm7, %v1085_v17, %v1128_v51  ;;  %v1304_v58 = vadd.f32 %v2762_v52, %v2920_v46 }
  0xbd   : > { %v1227_v11 = vrot.slane %v1226_v22, 4  ;;  %v1233_v23 = vsel %vm935_vm0, %v1223_v14, 0.0  ;;  %v1240_v35 = vsel %vm935_vm0, %v1224_v20, 0.0  ;;  %v1218_v1 = vsel %vm1217_vm8, %v1216_v33, %v1171_v30 }
  0xbe   : > { %v1225_v21 = vmul.f32 %v3167_v10, %v2917_v40  ;;  %v1234_v47 = vrot.slane %v1233_v23, 4  ;;  %v1241_v13 = vrot.slane %v1240_v35, 4  ;;  %v1220_v43 = vsel %vm1219_vm9, %v1218_v1, %v1214_v61 }
  0xbf   : > { %v1228_v26 = vadd.f32 %v1227_v11, %v1226_v22  ;;  %1221 = vst.msk [vmem:[%s837_s30 + $0x4] sm:$0xf] %vm1041_vm6, %v1220_v43  ;;  %v1367_v57 = vadd.f32 %v2823_v12, %v2922_v62  ;;  %v1430_v39 = vadd.f32 %v2882_v56, %v2924_v5  ;;  %v3168_v38 = vrot.slane %v2738_v24, %v2423_v2 }
  0xc0   : > { %v1247_v34 = vsel %vm935_vm0, %v1225_v21, 0.0  ;;  %v1235_v63 = vadd.f32 %v1234_v47, %v1233_v23  ;;  %v1242_v60 = vadd.f32 %v1241_v13, %v1240_v35  ;;  %v1453_v52 = vrot.slane %v2911_v44, %v2437_v7 }
  0xc1   : > { %v1248_v31 = vrot.slane %v1247_v34, 4  ;;  %v1229_v25 = vrot.slane %v1228_v26, 2  ;;  %v1312_v4 = vadd.f32 %v3168_v38, %v1304_v58  ;;  %v3169_v12 = vrot.slane %v2829_v32, %v2423_v2 }
  0xc2   : > { %v1236_v46 = vrot.slane %v1235_v63, 2  ;;  %v1243_v16 = vrot.slane %v1242_v60, 2  ;;  %v3170_v62 = vrot.slane %v2892_v45, %v2423_v2  ;;  %v3171_v44 = vrot.slane %v2755_v9, %v2426_v3 }
  0xc3   : > { %v1249_v8 = vadd.f32 %v1248_v31, %v1247_v34  ;;  %v1375_v56 = vadd.f32 %v3169_v12, %v1367_v57  ;;  %v1230_v24 = vadd.f32 %v1229_v25, %v1228_v26  ;;  %v3172_v14 = vstv %s2835_s17 }
  0xc4   : > { %v1438_v5 = vadd.f32 %v3170_v62, %v1430_v39  ;;  %v1320_v48 = vadd.f32 %v3171_v44, %v1312_v4  ;;  %v1461_v19 = vmul.f32 %v2511_v49, %v3172_v14  ;;  %v1237_v32 = vadd.f32 %v1236_v46, %v1235_v63  ;;  %v3182_v44 = vld [vmem:[#allocation13_spill] sm:$0xff] }
  0xc5   : > { %v1250_v59 = vrot.slane %v1249_v8, 2  ;;  %v1244_v20 = vadd.f32 %v1243_v16, %v1242_v60  ;;  %v3173_v36 = vrot.slane %v2838_v41, %v2426_v3  ;;  %v3174_v17 = vrot.slane %v2895_v0, %v2426_v3 }
  0xc6   : > { %v1231_v30 = vrot.slane %v1230_v24, 1  ;;  %v3175_v27 = vrot.slane %v2781_v37, %v2437_v7  ;;  %v1464_v10 = vstv %s2975_s28  ;;  %v1238_v21 = vrot.slane %v1237_v32, 1 }
  0xc7   : > { %v1383_v45 = vadd.f32 %v3173_v36, %v1375_v56  ;;  %v1446_v51 = vadd.f32 %v3174_v17, %v1438_v5  ;;  %v1251_v9 = vadd.f32 %v1250_v59, %v1249_v8  ;;  %v1245_v22 = vrot.slane %v1244_v20, 1  ;;  %v3177_v8 = vld [vmem:[#allocation14_spill] sm:$0xff] }
  0xc8   : > { %v1328_v61 = vadd.f32 %v3175_v27, %v1320_v48  ;;  %v3176_v41 = vrot.slane %v2841_v50, %v2437_v7  ;;  %v1232_v11 = vadd.f32 %v1231_v30, %v1230_v24  ;;  %v1465_v35 = vmul.f32 %v1464_v10, %v2544_v15  ;;  %v3181_v24 = vld [vmem:[#allocation16_spill] sm:$0xff] }
  0xc9   : > { %v1454_v33 = vadd.f32 %v1453_v52, %v1446_v51  ;;  %v1252_v23 = vrot.slane %v1251_v9, 1  ;;  %v1239_v1 = vadd.f32 %v1238_v21, %v1237_v32  ;;  %v1246_v47 = vadd.f32 %v1245_v22, %v1244_v20  ;;  %v3179_v52 = vld [vmem:[#allocation15_spill] sm:$0xff] }
  0xca   : > { %v1391_v0 = vadd.f32 %v3176_v41, %v1383_v45  ;;  %v1332_v37 = vadd.f32 %v2790_v53, %v1328_v61  ;;  %v1468_v26 = vstv %s2992_s29  ;;  %v1480_v31 = vstv %s2994_s0 }
  0xcb   : > { %v1458_v13 = vadd.f32 %v2914_v28, %v1454_v33  ;;  %v1253_v34 = vadd.f32 %v1252_v23, %v1251_v9  ;;  %v1258_v53 = vsel %vm1034_vm3, %v1239_v1, %v1232_v11  ;;  %v1481_v28 = vmul.f32 %v1480_v31, %v2879_v18 }
  0xcc   : > { %v1395_v50 = vadd.f32 %v2848_v6, %v1391_v0  ;;  %v1336_v43 = vadd.f32 %v2793_v54, %v1332_v37  ;;  %v1259_v54 = vsel %vm1036_vm4, %v1246_v47, %v1258_v53  ;;  %v1483_v60 = vstv %s3008_s1 }
  0xcd   : > { %v1462_v6 = vadd.f32 %v1461_v19, %v1458_v13  ;;  %v1487_v57 = vstv %s3010_s23  ;;  %v1260_v39 = vsel %vm1038_vm5, %v1253_v34, %v1259_v54  ;;  %v1484_v38 = vmul.f32 %v1483_v60, %v3177_v8 }
  0xce   : > { %v1399_v58 = vadd.f32 %v2851_v29, %v1395_v50  ;;  %v1340_v63 = vadd.f32 %v2808_v42, %v1336_v43  ;;  %1262 = vst.msk [vmem:[%s3044_s5] sm:$0xf] %vm1041_vm6, %v1260_v39  ;;  %v3178_v18 = vstv %s2732_s4  ;;  %v1488_v46 = vmul.f32 %v1487_v57, %v3179_v52  ;;  %s3073_s4 = sld [smem:[#allocation6 + $0x189]]  ;;  %v3183_v50 = vld [vmem:[#allocation12_spill] sm:$0xff] }
  0xcf   : > { %v1466_v29 = vadd.f32 %v1465_v35, %v1462_v6  ;;  %v1491_v42 = vstv %s3022_s24  ;;  %v1495_v16 = vstv %s3024_s16  ;;  %v3180_v12 = vstv %s2795_s26  ;;  %s1987_s26 = sld [smem:[#allocation7 + $0x3]] }
  0xd0   : > { %v1403_v25 = vadd.f32 %v2860_v55, %v1399_v58  ;;  %v1343_v4 = vadd.f32 %v3178_v18, %v1340_v63  ;;  %v1485_v5 = vadd.f32 %v1484_v38, %v1481_v28  ;;  %v1492_v55 = vmul.f32 %v1491_v42, %v3181_v24 }
  0xd1   : > { %v1469_v62 = vadd.f32 %v1468_v26, %v1466_v29  ;;  %v1496_v48 = vmul.f32 %v1495_v16, %v3182_v44  ;;  %v1503_v14 = vstv %s3031_s25  ;;  %v1511_v19 = vstv %s3033_s21 }
  0xd2   : > { %v1406_v56 = vadd.f32 %v3180_v12, %v1403_v25  ;;  %v1344_v59 = vmax.f32 %v1343_v4, 0.0  ;;  %v1489_v36 = vadd.f32 %v1488_v46, %v1485_v5  ;;  %v1504_v45 = vmul.f32 %v1503_v14, %v3182_v44 }
  0xd3   : > { %v1470_v20 = vmax.f32 %v1469_v62, 0.0  ;;  %v1500_v51 = vrot.slane %v1496_v48, %v2423_v2  ;;  %v1512_v30 = vmul.f32 %v1511_v19, %v3182_v44  ;;  %v1519_v41 = vstv %s3053_s6 }
  0xd4   : > { %v1407_v32 = vmax.f32 %v1406_v56, 0.0  ;;  %v1345_v17 = vmul.f32 %v1344_v59, %v2917_v40  ;;  %v1493_v61 = vadd.f32 %v1492_v55, %v1489_v36  ;;  %v1508_v10 = vrot.slane %v1504_v45, %v2426_v3 }
  0xd5   : > { %v1471_v27 = vmul.f32 %v1470_v20, %v2917_v40  ;;  %v1516_v22 = vrot.slane %v1512_v30, %v2437_v7  ;;  %v1523_v35 = vstv %s3065_s3  ;;  %v1520_v3 = vmul.f32 %v3183_v50, %v1519_v41 }
  0xd6   : > { %v1408_v9 = vmul.f32 %v1407_v32, %v2917_v40  ;;  %v1346_v21 = vsel %vm935_vm0, %v1345_v17, 0.0  ;;  %v1501_v11 = vadd.f32 %v1500_v51, %v1493_v61  ;;  %v1527_v43 = vstv %s3073_s4 }
  0xd7   : > { %v1347_v0 = vrot.slane %v1346_v21, 4  ;;  %v1472_v2 = vsel %vm935_vm0, %v1471_v27, 0.0  ;;  %v1524_v31 = vmul.f32 %v2511_v49, %v1523_v35  ;;  %v1528_v54 = vmul.f32 %v1527_v43, %v2544_v15 }
  0xd8   : > { %v1409_v33 = vsel %vm935_vm0, %v1408_v9, 0.0  ;;  %v1473_v37 = vrot.slane %v1472_v2, 4  ;;  %v1509_v47 = vadd.f32 %v1508_v10, %v1501_v11  ;;  %v1531_v8 = vstv %s1987_s26 }
  0xd9   : > { %v1410_v23 = vrot.slane %v1409_v33, 4  ;;  %v1348_v1 = vadd.f32 %v1347_v0, %v1346_v21 }
  0xda   : > { %v1474_v34 = vadd.f32 %v1473_v37, %v1472_v2  ;;  %v1517_v7 = vadd.f32 %v1516_v22, %v1509_v47 }
  0xdb   : > { %v1411_v13 = vadd.f32 %v1410_v23, %v1409_v33  ;;  %v1349_v26 = vrot.slane %v1348_v1, 2 }
  0xdc   : > { %v1475_v58 = vrot.slane %v1474_v34, 2  ;;  %v1521_v28 = vadd.f32 %v1520_v3, %v1517_v7 }
  0xdd   : > { %v1412_v53 = vrot.slane %v1411_v13, 2  ;;  %v1350_v6 = vadd.f32 %v1349_v26, %v1348_v1 }
  0xde   : > { %v1476_v60 = vadd.f32 %v1475_v58, %v1474_v34  ;;  %v1525_v39 = vadd.f32 %v1524_v31, %v1521_v28 }
  0xdf   : > { %v1413_v63 = vadd.f32 %v1412_v53, %v1411_v13  ;;  %v1351_v57 = vrot.slane %v1350_v6, 1 }
  0xe0   : > { %v1477_v29 = vrot.slane %v1476_v60, 1  ;;  %v1529_v18 = vadd.f32 %v1528_v54, %v1525_v39 }
  0xe1   : > { %v1414_v25 = vrot.slane %v1413_v63, 1  ;;  %v1352_v38 = vadd.f32 %v1351_v57, %v1350_v6 }
  0xe2   : > { %v1478_v52 = vadd.f32 %v1477_v29, %v1476_v60  ;;  %v1532_v46 = vadd.f32 %v1531_v8, %v1529_v18 }
  0xe3   : > { %v1415_v4 = vadd.f32 %v1414_v25, %v1413_v63 }
  0xe4   : > { %v1533_v42 = vmax.f32 %v1532_v46, 0.0 }
  0xe5   : > { %v1542_v49 = vsel %vm1215_vm7, %v1352_v38, %v1415_v4 }
  0xe6   : > { %v1543_v16 = vsel %vm1217_vm8, %v1542_v49, %v1478_v52  ;;  %v1534_v15 = vmul.f32 %v1533_v42, %v2917_v40 }
  0xe8   : > { %v1535_v12 = vsel %vm935_vm0, %v1534_v15, 0.0 }
  0xe9   : > { %v1536_v56 = vrot.slane %v1535_v12, 4 }
  0xeb   : > { %v1537_v62 = vadd.f32 %v1536_v56, %v1535_v12 }
  0xed   : > { %v1538_v5 = vrot.slane %v1537_v62, 2 }
  0xef   : > { %v1539_v24 = vadd.f32 %v1538_v5, %v1537_v62 }
  0xf1   : > { %v1540_v55 = vrot.slane %v1539_v24, 1 }
  0xf3   : > { %v1541_v59 = vadd.f32 %v1540_v55, %v1539_v24 }
  0xf5   : > { %v1544_v44 = vsel %vm1219_vm9, %v1543_v16, %v1541_v59 }
  0xf6   : > { %1545 = vst.msk [vmem:[%s3044_s5 + $0x4] sm:$0xf] %vm1041_vm6, %v1544_v44 }
  0xf7 PF: > { %s29_s20 = sadd.s32 1, %s2224_s20   ;;  %s3184_s18 = smov %s2220_s19 }
  0xf8   : > { %p26_p8 = scmp.ge.s32.totalorder %s29_s20, 6   ;;  %s3185_s19 = smov %s3187_s27 }
  0xfa   :  { %28 = sbr.rel (!%p26_p8) target bundleno = 13 (0xd), region = 167 }
 0x101   :  { %1611 = vsyncpa [#allocation3], 1 }
 0x102   :  { %1613 = vsyncpa [#allocation3 + $0x1], 1 }
 0x103   :  { %1614 = vsyncpa [#allocation5], 1 }
 0x104   :  { %1615 = vsyncpa [#allocation8], 1 }

</bundles_post_ra>
